<compile_context>
chip_gen: v7x
topology: tpu7x:2x2x1
jax: 0.10.0
libtpu: 0.0.40
codegen_flags: <defaults>
</compile_context>

<pallas_src>
import jax
import jax.numpy as jnp
import numpy as np
from jax.experimental import pallas as pl
from jax.experimental.pallas import tpu as pltpu

HIDDEN_SIZE = 4
INPUT_SIZE = 3
LAYERS_NUM = 1
OUT_FEATURES = 2


def lstm_kernel(x_ref, wih_f_ref, whh_f_ref, b_f_ref,
                wih_b_ref, b_b_ref,
                wfc_f_ref, wfc_b_ref, bfc_ref, out_ref):
    B, T, I = x_ref.shape
    H = whh_f_ref.shape[0]          # whh is stored transposed: (H, 4H)
    H3 = 3 * H

    # ---- load everything once (tiny) --------------------------------------
    xr = jnp.maximum(x_ref[...], 0.0)          # ReLU, (B, T, I)
    wih_f = wih_f_ref[...]                     # (I, 4H)   gate order [i,f,o,g]
    whh_f = whh_f_ref[...]                     # (H, 4H)
    b_f = b_f_ref[...]                         # (1, 4H)

    # ---- hoisted input projection for ALL time steps (off the recurrence) --
    # xg[b, t, :] = relu(x[b, t, :]) @ W_ih^T + (b_ih + b_hh), on the VPU.
    xg = xr[:, :, 0:1] * wih_f[0:1, :]
    for j in range(1, I):
        xg = xg + xr[:, :, j:j + 1] * wih_f[j:j + 1, :]
    xg = xg + b_f                              # (B, T, 4H); bias folded once

    # Hoist W_hh row slices out of the unrolled loop.
    whh_rows = [whh_f[k:k + 1, :] for k in range(H)]

    # ---- forward recurrence: fully unrolled, VPU-only per-step math --------
    h = jnp.zeros((B, H), jnp.float32)
    c = jnp.zeros((B, H), jnp.float32)
    for t in range(T):                         # T is static -> fully unrolled
        gates = xg[:, t, :]                    # (B, 4H)
        for k in range(H):                     # K = H = 4 broadcast mul-adds
            gates = gates + h[:, k:k + 1] * whh_rows[k]
        sig = jax.nn.sigmoid(gates[:, :H3])    # one EUP pass: [i, f, o]
        g = jnp.tanh(gates[:, H3:])            # one EUP pass: g
        c = sig[:, H:2 * H] * c + sig[:, :H] * g
        h = sig[:, 2 * H:H3] * jnp.tanh(c)
    h_fwd = h

    # ---- backward direction: single step from zero state on x[:, T-1, :] ---
    # (h0 = 0 makes the h @ W_hh term exactly zero, so it is dropped.)
    x_last = xr[:, T - 1, :]                   # (B, I), already ReLU'd
    wih_b = wih_b_ref[...]                     # (I, 4H)
    gates_b = x_last[:, 0:1] * wih_b[0:1, :]
    for j in range(1, I):
        gates_b = gates_b + x_last[:, j:j + 1] * wih_b[j:j + 1, :]
    gates_b = gates_b + b_b_ref[...]
    sig_b = jax.nn.sigmoid(gates_b[:, :H3])
    g_b = jnp.tanh(gates_b[:, H3:])
    c_b = sig_b[:, :H] * g_b                   # i * g   (f * 0 dropped)
    h_bwd = sig_b[:, 2 * H:H3] * jnp.tanh(c_b)

    # ---- final FC: out = [h_fwd, h_bwd] @ W_fc^T + b_fc (split, no concat) --
    wfc_f = wfc_f_ref[...]                     # (H, O)
    wfc_b = wfc_b_ref[...]                     # (H, O)
    out = h_fwd[:, 0:1] * wfc_f[0:1, :]
    for k in range(1, H):
        out = out + h_fwd[:, k:k + 1] * wfc_f[k:k + 1, :]
    for k in range(H):
        out = out + h_bwd[:, k:k + 1] * wfc_b[k:k + 1, :]
    out_ref[...] = out + bfc_ref[...]


def _permute_gates(w):
    """Permute PyTorch gate order [i, f, g, o] -> kernel order [i, f, o, g].

    Works on any array whose leading dim is 4*H (weights or biases).
    """
    H = HIDDEN_SIZE
    return jnp.concatenate([w[:2 * H], w[3 * H:4 * H], w[2 * H:3 * H]], axis=0)


def lstm_forward(x, params):
    """x: (B, T, I) float32 (PyTorch batch_first layout). Returns (B, out_features)."""
    B, T, I = x.shape
    H = HIDDEN_SIZE

    # Weight prep (glue): permute gates to [i,f,o,g], transpose for (B,K)@(K,N),
    # fold the two LSTM biases together, split the FC weight by direction.
    wih_f_t = _permute_gates(params["w_ih_f"]).T                        # (I, 4H)
    whh_f_t = _permute_gates(params["w_hh_f"]).T                        # (H, 4H)
    b_f = _permute_gates(params["b_ih_f"] + params["b_hh_f"]).reshape(1, 4 * H)
    wih_b_t = _permute_gates(params["w_ih_b"]).T                        # (I, 4H)
    b_b = _permute_gates(params["b_ih_b"] + params["b_hh_b"]).reshape(1, 4 * H)
    wfc_f = params["w_fc"][:, :H].T                                     # (H, O)
    wfc_b = params["w_fc"][:, H:].T                                     # (H, O)
    bfc = params["b_fc"].reshape(1, OUT_FEATURES)

    inputs = (x, wih_f_t, whh_f_t, b_f, wih_b_t, b_b, wfc_f, wfc_b, bfc)

    def full_spec(a):
        nd = a.ndim
        return pl.BlockSpec(a.shape, lambda i, _nd=nd: (0,) * _nd)

    return pl.pallas_call(
        lstm_kernel,
        out_shape=jax.ShapeDtypeStruct((B, OUT_FEATURES), jnp.float32),
        grid=(1,),
        in_specs=[full_spec(a) for a in inputs],
        out_specs=pl.BlockSpec((B, OUT_FEATURES), lambda i: (0, 0)),
        compiler_params=pltpu.CompilerParams(
            dimension_semantics=("arbitrary",)),
    )(*inputs)


def make_params(key):
    """Deterministic init mirroring torch.nn.LSTM/Linear default U(-1/sqrt(fan), 1/sqrt(fan))."""
    H, I, O = HIDDEN_SIZE, INPUT_SIZE, OUT_FEATURES
    bound_lstm = 1.0 / np.sqrt(H)
    bound_fc = 1.0 / np.sqrt(2 * H)
    keys = jax.random.split(key, 10)

    def u(k, shape, bound):
        return jax.random.uniform(k, shape, jnp.float32, -bound, bound)

    return {
        "w_ih_f": u(keys[0], (4 * H, I), bound_lstm),
        "w_hh_f": u(keys[1], (4 * H, H), bound_lstm),
        "b_ih_f": u(keys[2], (4 * H,), bound_lstm),
        "b_hh_f": u(keys[3], (4 * H,), bound_lstm),
        "w_ih_b": u(keys[4], (4 * H, I), bound_lstm),
        "w_hh_b": u(keys[5], (4 * H, H), bound_lstm),
        "b_ih_b": u(keys[6], (4 * H,), bound_lstm),
        "b_hh_b": u(keys[7], (4 * H,), bound_lstm),
        "w_fc": u(keys[8], (O, 2 * H), bound_fc),
        "b_fc": u(keys[9], (O,), bound_fc),
    }


def reference_forward(x, params):
    """Pure-JAX reference matching torch semantics (PyTorch [i,f,g,o] order)."""
    H = HIDDEN_SIZE
    B, T, _ = x.shape
    xr = jnp.maximum(x, 0.0)

    def step(x_t, h, c, w_ih, w_hh, b_ih, b_hh):
        g = x_t @ w_ih.T + b_ih + h @ w_hh.T + b_hh
        i = jax.nn.sigmoid(g[:, :H])
        f = jax.nn.sigmoid(g[:, H:2 * H])
        gg = jnp.tanh(g[:, 2 * H:3 * H])
        o = jax.nn.sigmoid(g[:, 3 * H:])
        c = f * c + i * gg
        h = o * jnp.tanh(c)
        return h, c

    h = jnp.zeros((B, H)); c = jnp.zeros((B, H))
    for t in range(T):
        h, c = step(xr[:, t], h, c, params["w_ih_f"], params["w_hh_f"],
                    params["b_ih_f"], params["b_hh_f"])
    h_fwd = h
    h0 = jnp.zeros((B, H)); c0 = jnp.zeros((B, H))
    h_bwd, _ = step(xr[:, T - 1], h0, c0, params["w_ih_b"], params["w_hh_b"],
                    params["b_ih_b"], params["b_hh_b"])
    out = jnp.concatenate([h_fwd, h_bwd], axis=-1)
    return out @ params["w_fc"].T + params["b_fc"]


if __name__ == "__main__":
    key = jax.random.PRNGKey(0)
    k_x, k_p = jax.random.split(key)

    B, T = 2, 8
    x = jax.random.normal(k_x, (B, T, INPUT_SIZE), jnp.float32)
    params = make_params(k_p)

    out = lstm_forward(x, params)
    out = jax.block_until_ready(out)

    ref = reference_forward(x, params)
    np.testing.assert_allclose(np.asarray(out), np.asarray(ref),
                               rtol=1e-5, atol=1e-5)
    print("KERNEL_OK")
</pallas_src>

<mosaic_0001>
module attributes {stable_mosaic.version = 11 : i64} {
  func.func @lstm_kernel(%arg0: i32, %arg1: memref<2x8x3xf32, #tpu.memory_space<vmem>>, %arg2: memref<3x16xf32, #tpu.memory_space<vmem>>, %arg3: memref<4x16xf32, #tpu.memory_space<vmem>>, %arg4: memref<1x16xf32, #tpu.memory_space<vmem>>, %arg5: memref<3x16xf32, #tpu.memory_space<vmem>>, %arg6: memref<1x16xf32, #tpu.memory_space<vmem>>, %arg7: memref<4x2xf32, #tpu.memory_space<vmem>>, %arg8: memref<4x2xf32, #tpu.memory_space<vmem>>, %arg9: memref<1x2xf32, #tpu.memory_space<vmem>>, %arg10: memref<2x2xf32, #tpu.memory_space<vmem>>) attributes {dimension_semantics = [#tpu.dimension_semantics<arbitrary>], iteration_bounds = array<i64: 1>, scalar_prefetch = 0 : i64, scratch_operands = 0 : i64, tpu.core_type = #tpu.core_type<tc>, window_params = [{pipeline_mode = #tpu.pipeline_mode<synchronous>, transform_indices = @transform_0, window_bounds = array<i64: 2, 8, 3>}, {pipeline_mode = #tpu.pipeline_mode<synchronous>, transform_indices = @transform_1, window_bounds = array<i64: 3, 16>}, {pipeline_mode = #tpu.pipeline_mode<synchronous>, transform_indices = @transform_2, window_bounds = array<i64: 4, 16>}, {pipeline_mode = #tpu.pipeline_mode<synchronous>, transform_indices = @transform_3, window_bounds = array<i64: 1, 16>}, {pipeline_mode = #tpu.pipeline_mode<synchronous>, transform_indices = @transform_4, window_bounds = array<i64: 3, 16>}, {pipeline_mode = #tpu.pipeline_mode<synchronous>, transform_indices = @transform_5, window_bounds = array<i64: 1, 16>}, {pipeline_mode = #tpu.pipeline_mode<synchronous>, transform_indices = @transform_6, window_bounds = array<i64: 4, 2>}, {pipeline_mode = #tpu.pipeline_mode<synchronous>, transform_indices = @transform_7, window_bounds = array<i64: 4, 2>}, {pipeline_mode = #tpu.pipeline_mode<synchronous>, transform_indices = @transform_8, window_bounds = array<i64: 1, 2>}, {pipeline_mode = #tpu.pipeline_mode<synchronous>, transform_indices = @transform_9, window_bounds = array<i64: 2, 2>}]} {
    %c0 = arith.constant 0 : index
    %c0_0 = arith.constant 0 : index
    %c0_1 = arith.constant 0 : index
    %0 = vector.load %arg1[%c0, %c0_0, %c0_1] : memref<2x8x3xf32, #tpu.memory_space<vmem>>, vector<2x8x3xf32>
    %cst = arith.constant 0.000000e+00 : f32
    %1 = vector.broadcast %cst : f32 to vector<2x8x3xf32>
    %2 = arith.maximumf %0, %1 : vector<2x8x3xf32>
    %c0_2 = arith.constant 0 : index
    %c0_3 = arith.constant 0 : index
    %3 = vector.load %arg2[%c0_2, %c0_3] : memref<3x16xf32, #tpu.memory_space<vmem>>, vector<3x16xf32>
    %c0_4 = arith.constant 0 : index
    %c0_5 = arith.constant 0 : index
    %4 = vector.load %arg3[%c0_4, %c0_5] : memref<4x16xf32, #tpu.memory_space<vmem>>, vector<4x16xf32>
    %c0_6 = arith.constant 0 : index
    %c0_7 = arith.constant 0 : index
    %5 = vector.load %arg4[%c0_6, %c0_7] : memref<1x16xf32, #tpu.memory_space<vmem>>, vector<1x16xf32>
    %6 = vector.extract_strided_slice %2 {offsets = [0, 0, 0], sizes = [2, 8, 1], strides = [1, 1, 1]} : vector<2x8x3xf32> to vector<2x8x1xf32>
    %7 = vector.extract_strided_slice %3 {offsets = [0, 0], sizes = [1, 16], strides = [1, 1]} : vector<3x16xf32> to vector<1x16xf32>
    %8 = vector.shape_cast %7 : vector<1x16xf32> to vector<1x1x16xf32>
    %9 = vector.broadcast %6 : vector<2x8x1xf32> to vector<2x8x16xf32>
    %10 = vector.broadcast %8 : vector<1x1x16xf32> to vector<2x8x16xf32>
    %11 = arith.mulf %9, %10 : vector<2x8x16xf32>
    %12 = vector.extract_strided_slice %2 {offsets = [0, 0, 1], sizes = [2, 8, 1], strides = [1, 1, 1]} : vector<2x8x3xf32> to vector<2x8x1xf32>
    %13 = vector.extract_strided_slice %3 {offsets = [1, 0], sizes = [1, 16], strides = [1, 1]} : vector<3x16xf32> to vector<1x16xf32>
    %14 = vector.shape_cast %13 : vector<1x16xf32> to vector<1x1x16xf32>
    %15 = vector.broadcast %12 : vector<2x8x1xf32> to vector<2x8x16xf32>
    %16 = vector.broadcast %14 : vector<1x1x16xf32> to vector<2x8x16xf32>
    %17 = arith.mulf %15, %16 : vector<2x8x16xf32>
    %18 = arith.addf %11, %17 : vector<2x8x16xf32>
    %19 = vector.extract_strided_slice %2 {offsets = [0, 0, 2], sizes = [2, 8, 1], strides = [1, 1, 1]} : vector<2x8x3xf32> to vector<2x8x1xf32>
    %20 = vector.extract_strided_slice %3 {offsets = [2, 0], sizes = [1, 16], strides = [1, 1]} : vector<3x16xf32> to vector<1x16xf32>
    %21 = vector.shape_cast %20 : vector<1x16xf32> to vector<1x1x16xf32>
    %22 = vector.broadcast %19 : vector<2x8x1xf32> to vector<2x8x16xf32>
    %23 = vector.broadcast %21 : vector<1x1x16xf32> to vector<2x8x16xf32>
    %24 = arith.mulf %22, %23 : vector<2x8x16xf32>
    %25 = arith.addf %18, %24 : vector<2x8x16xf32>
    %26 = vector.shape_cast %5 : vector<1x16xf32> to vector<1x1x16xf32>
    %27 = vector.broadcast %26 : vector<1x1x16xf32> to vector<2x8x16xf32>
    %28 = arith.addf %25, %27 : vector<2x8x16xf32>
    %29 = vector.extract_strided_slice %4 {offsets = [0, 0], sizes = [1, 16], strides = [1, 1]} : vector<4x16xf32> to vector<1x16xf32>
    %30 = vector.extract_strided_slice %4 {offsets = [1, 0], sizes = [1, 16], strides = [1, 1]} : vector<4x16xf32> to vector<1x16xf32>
    %31 = vector.extract_strided_slice %4 {offsets = [2, 0], sizes = [1, 16], strides = [1, 1]} : vector<4x16xf32> to vector<1x16xf32>
    %32 = vector.extract_strided_slice %4 {offsets = [3, 0], sizes = [1, 16], strides = [1, 1]} : vector<4x16xf32> to vector<1x16xf32>
    %cst_8 = arith.constant 0.000000e+00 : f32
    %33 = vector.broadcast %cst_8 : f32 to vector<2x4xf32>
    %cst_9 = arith.constant 0.000000e+00 : f32
    %34 = vector.broadcast %cst_9 : f32 to vector<2x4xf32>
    %35 = vector.extract_strided_slice %28 {offsets = [0, 0, 0], sizes = [2, 1, 16], strides = [1, 1, 1]} : vector<2x8x16xf32> to vector<2x1x16xf32>
    %36 = vector.shape_cast %35 : vector<2x1x16xf32> to vector<2x16xf32>
    %37 = vector.extract_strided_slice %33 {offsets = [0, 0], sizes = [2, 1], strides = [1, 1]} : vector<2x4xf32> to vector<2x1xf32>
    %38 = vector.broadcast %37 : vector<2x1xf32> to vector<2x16xf32>
    %39 = vector.broadcast %29 : vector<1x16xf32> to vector<2x16xf32>
    %40 = arith.mulf %38, %39 : vector<2x16xf32>
    %41 = arith.addf %36, %40 : vector<2x16xf32>
    %42 = vector.extract_strided_slice %33 {offsets = [0, 1], sizes = [2, 1], strides = [1, 1]} : vector<2x4xf32> to vector<2x1xf32>
    %43 = vector.broadcast %42 : vector<2x1xf32> to vector<2x16xf32>
    %44 = vector.broadcast %30 : vector<1x16xf32> to vector<2x16xf32>
    %45 = arith.mulf %43, %44 : vector<2x16xf32>
    %46 = arith.addf %41, %45 : vector<2x16xf32>
    %47 = vector.extract_strided_slice %33 {offsets = [0, 2], sizes = [2, 1], strides = [1, 1]} : vector<2x4xf32> to vector<2x1xf32>
    %48 = vector.broadcast %47 : vector<2x1xf32> to vector<2x16xf32>
    %49 = vector.broadcast %31 : vector<1x16xf32> to vector<2x16xf32>
    %50 = arith.mulf %48, %49 : vector<2x16xf32>
    %51 = arith.addf %46, %50 : vector<2x16xf32>
    %52 = vector.extract_strided_slice %33 {offsets = [0, 3], sizes = [2, 1], strides = [1, 1]} : vector<2x4xf32> to vector<2x1xf32>
    %53 = vector.broadcast %52 : vector<2x1xf32> to vector<2x16xf32>
    %54 = vector.broadcast %32 : vector<1x16xf32> to vector<2x16xf32>
    %55 = arith.mulf %53, %54 : vector<2x16xf32>
    %56 = arith.addf %51, %55 : vector<2x16xf32>
    %57 = vector.extract_strided_slice %56 {offsets = [0, 0], sizes = [2, 12], strides = [1, 1]} : vector<2x16xf32> to vector<2x12xf32>
    %58 = arith.negf %57 : vector<2x12xf32>
    %59 = math.exp %58 : vector<2x12xf32>
    %cst_10 = arith.constant 1.000000e+00 : f32
    %60 = vector.broadcast %cst_10 : f32 to vector<2x12xf32>
    %61 = arith.addf %60, %59 : vector<2x12xf32>
    %62 = arith.divf %60, %61 : vector<2x12xf32>
    %63 = vector.extract_strided_slice %56 {offsets = [0, 12], sizes = [2, 4], strides = [1, 1]} : vector<2x16xf32> to vector<2x4xf32>
    %64 = math.tanh %63 : vector<2x4xf32>
    %65 = vector.extract_strided_slice %62 {offsets = [0, 4], sizes = [2, 4], strides = [1, 1]} : vector<2x12xf32> to vector<2x4xf32>
    %66 = arith.mulf %65, %34 : vector<2x4xf32>
    %67 = vector.extract_strided_slice %62 {offsets = [0, 0], sizes = [2, 4], strides = [1, 1]} : vector<2x12xf32> to vector<2x4xf32>
    %68 = arith.mulf %67, %64 : vector<2x4xf32>
    %69 = arith.addf %66, %68 : vector<2x4xf32>
    %70 = vector.extract_strided_slice %62 {offsets = [0, 8], sizes = [2, 4], strides = [1, 1]} : vector<2x12xf32> to vector<2x4xf32>
    %71 = math.tanh %69 : vector<2x4xf32>
    %72 = arith.mulf %70, %71 : vector<2x4xf32>
    %73 = vector.extract_strided_slice %28 {offsets = [0, 1, 0], sizes = [2, 1, 16], strides = [1, 1, 1]} : vector<2x8x16xf32> to vector<2x1x16xf32>
    %74 = vector.shape_cast %73 : vector<2x1x16xf32> to vector<2x16xf32>
    %75 = vector.extract_strided_slice %72 {offsets = [0, 0], sizes = [2, 1], strides = [1, 1]} : vector<2x4xf32> to vector<2x1xf32>
    %76 = vector.broadcast %75 : vector<2x1xf32> to vector<2x16xf32>
    %77 = vector.broadcast %29 : vector<1x16xf32> to vector<2x16xf32>
    %78 = arith.mulf %76, %77 : vector<2x16xf32>
    %79 = arith.addf %74, %78 : vector<2x16xf32>
    %80 = vector.extract_strided_slice %72 {offsets = [0, 1], sizes = [2, 1], strides = [1, 1]} : vector<2x4xf32> to vector<2x1xf32>
    %81 = vector.broadcast %80 : vector<2x1xf32> to vector<2x16xf32>
    %82 = vector.broadcast %30 : vector<1x16xf32> to vector<2x16xf32>
    %83 = arith.mulf %81, %82 : vector<2x16xf32>
    %84 = arith.addf %79, %83 : vector<2x16xf32>
    %85 = vector.extract_strided_slice %72 {offsets = [0, 2], sizes = [2, 1], strides = [1, 1]} : vector<2x4xf32> to vector<2x1xf32>
    %86 = vector.broadcast %85 : vector<2x1xf32> to vector<2x16xf32>
    %87 = vector.broadcast %31 : vector<1x16xf32> to vector<2x16xf32>
    %88 = arith.mulf %86, %87 : vector<2x16xf32>
    %89 = arith.addf %84, %88 : vector<2x16xf32>
    %90 = vector.extract_strided_slice %72 {offsets = [0, 3], sizes = [2, 1], strides = [1, 1]} : vector<2x4xf32> to vector<2x1xf32>
    %91 = vector.broadcast %90 : vector<2x1xf32> to vector<2x16xf32>
    %92 = vector.broadcast %32 : vector<1x16xf32> to vector<2x16xf32>
    %93 = arith.mulf %91, %92 : vector<2x16xf32>
    %94 = arith.addf %89, %93 : vector<2x16xf32>
    %95 = vector.extract_strided_slice %94 {offsets = [0, 0], sizes = [2, 12], strides = [1, 1]} : vector<2x16xf32> to vector<2x12xf32>
    %96 = arith.negf %95 : vector<2x12xf32>
    %97 = math.exp %96 : vector<2x12xf32>
    %cst_11 = arith.constant 1.000000e+00 : f32
    %98 = vector.broadcast %cst_11 : f32 to vector<2x12xf32>
    %99 = arith.addf %98, %97 : vector<2x12xf32>
    %100 = arith.divf %98, %99 : vector<2x12xf32>
    %101 = vector.extract_strided_slice %94 {offsets = [0, 12], sizes = [2, 4], strides = [1, 1]} : vector<2x16xf32> to vector<2x4xf32>
    %102 = math.tanh %101 : vector<2x4xf32>
    %103 = vector.extract_strided_slice %100 {offsets = [0, 4], sizes = [2, 4], strides = [1, 1]} : vector<2x12xf32> to vector<2x4xf32>
    %104 = arith.mulf %103, %69 : vector<2x4xf32>
    %105 = vector.extract_strided_slice %100 {offsets = [0, 0], sizes = [2, 4], strides = [1, 1]} : vector<2x12xf32> to vector<2x4xf32>
    %106 = arith.mulf %105, %102 : vector<2x4xf32>
    %107 = arith.addf %104, %106 : vector<2x4xf32>
    %108 = vector.extract_strided_slice %100 {offsets = [0, 8], sizes = [2, 4], strides = [1, 1]} : vector<2x12xf32> to vector<2x4xf32>
    %109 = math.tanh %107 : vector<2x4xf32>
    %110 = arith.mulf %108, %109 : vector<2x4xf32>
    %111 = vector.extract_strided_slice %28 {offsets = [0, 2, 0], sizes = [2, 1, 16], strides = [1, 1, 1]} : vector<2x8x16xf32> to vector<2x1x16xf32>
    %112 = vector.shape_cast %111 : vector<2x1x16xf32> to vector<2x16xf32>
    %113 = vector.extract_strided_slice %110 {offsets = [0, 0], sizes = [2, 1], strides = [1, 1]} : vector<2x4xf32> to vector<2x1xf32>
    %114 = vector.broadcast %113 : vector<2x1xf32> to vector<2x16xf32>
    %115 = vector.broadcast %29 : vector<1x16xf32> to vector<2x16xf32>
    %116 = arith.mulf %114, %115 : vector<2x16xf32>
    %117 = arith.addf %112, %116 : vector<2x16xf32>
    %118 = vector.extract_strided_slice %110 {offsets = [0, 1], sizes = [2, 1], strides = [1, 1]} : vector<2x4xf32> to vector<2x1xf32>
    %119 = vector.broadcast %118 : vector<2x1xf32> to vector<2x16xf32>
    %120 = vector.broadcast %30 : vector<1x16xf32> to vector<2x16xf32>
    %121 = arith.mulf %119, %120 : vector<2x16xf32>
    %122 = arith.addf %117, %121 : vector<2x16xf32>
    %123 = vector.extract_strided_slice %110 {offsets = [0, 2], sizes = [2, 1], strides = [1, 1]} : vector<2x4xf32> to vector<2x1xf32>
    %124 = vector.broadcast %123 : vector<2x1xf32> to vector<2x16xf32>
    %125 = vector.broadcast %31 : vector<1x16xf32> to vector<2x16xf32>
    %126 = arith.mulf %124, %125 : vector<2x16xf32>
    %127 = arith.addf %122, %126 : vector<2x16xf32>
    %128 = vector.extract_strided_slice %110 {offsets = [0, 3], sizes = [2, 1], strides = [1, 1]} : vector<2x4xf32> to vector<2x1xf32>
    %129 = vector.broadcast %128 : vector<2x1xf32> to vector<2x16xf32>
    %130 = vector.broadcast %32 : vector<1x16xf32> to vector<2x16xf32>
    %131 = arith.mulf %129, %130 : vector<2x16xf32>
    %132 = arith.addf %127, %131 : vector<2x16xf32>
    %133 = vector.extract_strided_slice %132 {offsets = [0, 0], sizes = [2, 12], strides = [1, 1]} : vector<2x16xf32> to vector<2x12xf32>
    %134 = arith.negf %133 : vector<2x12xf32>
    %135 = math.exp %134 : vector<2x12xf32>
    %cst_12 = arith.constant 1.000000e+00 : f32
    %136 = vector.broadcast %cst_12 : f32 to vector<2x12xf32>
    %137 = arith.addf %136, %135 : vector<2x12xf32>
    %138 = arith.divf %136, %137 : vector<2x12xf32>
    %139 = vector.extract_strided_slice %132 {offsets = [0, 12], sizes = [2, 4], strides = [1, 1]} : vector<2x16xf32> to vector<2x4xf32>
    %140 = math.tanh %139 : vector<2x4xf32>
    %141 = vector.extract_strided_slice %138 {offsets = [0, 4], sizes = [2, 4], strides = [1, 1]} : vector<2x12xf32> to vector<2x4xf32>
    %142 = arith.mulf %141, %107 : vector<2x4xf32>
    %143 = vector.extract_strided_slice %138 {offsets = [0, 0], sizes = [2, 4], strides = [1, 1]} : vector<2x12xf32> to vector<2x4xf32>
    %144 = arith.mulf %143, %140 : vector<2x4xf32>
    %145 = arith.addf %142, %144 : vector<2x4xf32>
    %146 = vector.extract_strided_slice %138 {offsets = [0, 8], sizes = [2, 4], strides = [1, 1]} : vector<2x12xf32> to vector<2x4xf32>
    %147 = math.tanh %145 : vector<2x4xf32>
    %148 = arith.mulf %146, %147 : vector<2x4xf32>
    %149 = vector.extract_strided_slice %28 {offsets = [0, 3, 0], sizes = [2, 1, 16], strides = [1, 1, 1]} : vector<2x8x16xf32> to vector<2x1x16xf32>
    %150 = vector.shape_cast %149 : vector<2x1x16xf32> to vector<2x16xf32>
    %151 = vector.extract_strided_slice %148 {offsets = [0, 0], sizes = [2, 1], strides = [1, 1]} : vector<2x4xf32> to vector<2x1xf32>
    %152 = vector.broadcast %151 : vector<2x1xf32> to vector<2x16xf32>
    %153 = vector.broadcast %29 : vector<1x16xf32> to vector<2x16xf32>
    %154 = arith.mulf %152, %153 : vector<2x16xf32>
    %155 = arith.addf %150, %154 : vector<2x16xf32>
    %156 = vector.extract_strided_slice %148 {offsets = [0, 1], sizes = [2, 1], strides = [1, 1]} : vector<2x4xf32> to vector<2x1xf32>
    %157 = vector.broadcast %156 : vector<2x1xf32> to vector<2x16xf32>
    %158 = vector.broadcast %30 : vector<1x16xf32> to vector<2x16xf32>
    %159 = arith.mulf %157, %158 : vector<2x16xf32>
    %160 = arith.addf %155, %159 : vector<2x16xf32>
    %161 = vector.extract_strided_slice %148 {offsets = [0, 2], sizes = [2, 1], strides = [1, 1]} : vector<2x4xf32> to vector<2x1xf32>
    %162 = vector.broadcast %161 : vector<2x1xf32> to vector<2x16xf32>
    %163 = vector.broadcast %31 : vector<1x16xf32> to vector<2x16xf32>
    %164 = arith.mulf %162, %163 : vector<2x16xf32>
    %165 = arith.addf %160, %164 : vector<2x16xf32>
    %166 = vector.extract_strided_slice %148 {offsets = [0, 3], sizes = [2, 1], strides = [1, 1]} : vector<2x4xf32> to vector<2x1xf32>
    %167 = vector.broadcast %166 : vector<2x1xf32> to vector<2x16xf32>
    %168 = vector.broadcast %32 : vector<1x16xf32> to vector<2x16xf32>
    %169 = arith.mulf %167, %168 : vector<2x16xf32>
    %170 = arith.addf %165, %169 : vector<2x16xf32>
    %171 = vector.extract_strided_slice %170 {offsets = [0, 0], sizes = [2, 12], strides = [1, 1]} : vector<2x16xf32> to vector<2x12xf32>
    %172 = arith.negf %171 : vector<2x12xf32>
    %173 = math.exp %172 : vector<2x12xf32>
    %cst_13 = arith.constant 1.000000e+00 : f32
    %174 = vector.broadcast %cst_13 : f32 to vector<2x12xf32>
    %175 = arith.addf %174, %173 : vector<2x12xf32>
    %176 = arith.divf %174, %175 : vector<2x12xf32>
    %177 = vector.extract_strided_slice %170 {offsets = [0, 12], sizes = [2, 4], strides = [1, 1]} : vector<2x16xf32> to vector<2x4xf32>
    %178 = math.tanh %177 : vector<2x4xf32>
    %179 = vector.extract_strided_slice %176 {offsets = [0, 4], sizes = [2, 4], strides = [1, 1]} : vector<2x12xf32> to vector<2x4xf32>
    %180 = arith.mulf %179, %145 : vector<2x4xf32>
    %181 = vector.extract_strided_slice %176 {offsets = [0, 0], sizes = [2, 4], strides = [1, 1]} : vector<2x12xf32> to vector<2x4xf32>
    %182 = arith.mulf %181, %178 : vector<2x4xf32>
    %183 = arith.addf %180, %182 : vector<2x4xf32>
    %184 = vector.extract_strided_slice %176 {offsets = [0, 8], sizes = [2, 4], strides = [1, 1]} : vector<2x12xf32> to vector<2x4xf32>
    %185 = math.tanh %183 : vector<2x4xf32>
    %186 = arith.mulf %184, %185 : vector<2x4xf32>
    %187 = vector.extract_strided_slice %28 {offsets = [0, 4, 0], sizes = [2, 1, 16], strides = [1, 1, 1]} : vector<2x8x16xf32> to vector<2x1x16xf32>
    %188 = vector.shape_cast %187 : vector<2x1x16xf32> to vector<2x16xf32>
    %189 = vector.extract_strided_slice %186 {offsets = [0, 0], sizes = [2, 1], strides = [1, 1]} : vector<2x4xf32> to vector<2x1xf32>
    %190 = vector.broadcast %189 : vector<2x1xf32> to vector<2x16xf32>
    %191 = vector.broadcast %29 : vector<1x16xf32> to vector<2x16xf32>
    %192 = arith.mulf %190, %191 : vector<2x16xf32>
    %193 = arith.addf %188, %192 : vector<2x16xf32>
    %194 = vector.extract_strided_slice %186 {offsets = [0, 1], sizes = [2, 1], strides = [1, 1]} : vector<2x4xf32> to vector<2x1xf32>
    %195 = vector.broadcast %194 : vector<2x1xf32> to vector<2x16xf32>
    %196 = vector.broadcast %30 : vector<1x16xf32> to vector<2x16xf32>
    %197 = arith.mulf %195, %196 : vector<2x16xf32>
    %198 = arith.addf %193, %197 : vector<2x16xf32>
    %199 = vector.extract_strided_slice %186 {offsets = [0, 2], sizes = [2, 1], strides = [1, 1]} : vector<2x4xf32> to vector<2x1xf32>
    %200 = vector.broadcast %199 : vector<2x1xf32> to vector<2x16xf32>
    %201 = vector.broadcast %31 : vector<1x16xf32> to vector<2x16xf32>
    %202 = arith.mulf %200, %201 : vector<2x16xf32>
    %203 = arith.addf %198, %202 : vector<2x16xf32>
    %204 = vector.extract_strided_slice %186 {offsets = [0, 3], sizes = [2, 1], strides = [1, 1]} : vector<2x4xf32> to vector<2x1xf32>
    %205 = vector.broadcast %204 : vector<2x1xf32> to vector<2x16xf32>
    %206 = vector.broadcast %32 : vector<1x16xf32> to vector<2x16xf32>
    %207 = arith.mulf %205, %206 : vector<2x16xf32>
    %208 = arith.addf %203, %207 : vector<2x16xf32>
    %209 = vector.extract_strided_slice %208 {offsets = [0, 0], sizes = [2, 12], strides = [1, 1]} : vector<2x16xf32> to vector<2x12xf32>
    %210 = arith.negf %209 : vector<2x12xf32>
    %211 = math.exp %210 : vector<2x12xf32>
    %cst_14 = arith.constant 1.000000e+00 : f32
    %212 = vector.broadcast %cst_14 : f32 to vector<2x12xf32>
    %213 = arith.addf %212, %211 : vector<2x12xf32>
    %214 = arith.divf %212, %213 : vector<2x12xf32>
    %215 = vector.extract_strided_slice %208 {offsets = [0, 12], sizes = [2, 4], strides = [1, 1]} : vector<2x16xf32> to vector<2x4xf32>
    %216 = math.tanh %215 : vector<2x4xf32>
    %217 = vector.extract_strided_slice %214 {offsets = [0, 4], sizes = [2, 4], strides = [1, 1]} : vector<2x12xf32> to vector<2x4xf32>
    %218 = arith.mulf %217, %183 : vector<2x4xf32>
    %219 = vector.extract_strided_slice %214 {offsets = [0, 0], sizes = [2, 4], strides = [1, 1]} : vector<2x12xf32> to vector<2x4xf32>
    %220 = arith.mulf %219, %216 : vector<2x4xf32>
    %221 = arith.addf %218, %220 : vector<2x4xf32>
    %222 = vector.extract_strided_slice %214 {offsets = [0, 8], sizes = [2, 4], strides = [1, 1]} : vector<2x12xf32> to vector<2x4xf32>
    %223 = math.tanh %221 : vector<2x4xf32>
    %224 = arith.mulf %222, %223 : vector<2x4xf32>
    %225 = vector.extract_strided_slice %28 {offsets = [0, 5, 0], sizes = [2, 1, 16], strides = [1, 1, 1]} : vector<2x8x16xf32> to vector<2x1x16xf32>
    %226 = vector.shape_cast %225 : vector<2x1x16xf32> to vector<2x16xf32>
    %227 = vector.extract_strided_slice %224 {offsets = [0, 0], sizes = [2, 1], strides = [1, 1]} : vector<2x4xf32> to vector<2x1xf32>
    %228 = vector.broadcast %227 : vector<2x1xf32> to vector<2x16xf32>
    %229 = vector.broadcast %29 : vector<1x16xf32> to vector<2x16xf32>
    %230 = arith.mulf %228, %229 : vector<2x16xf32>
    %231 = arith.addf %226, %230 : vector<2x16xf32>
    %232 = vector.extract_strided_slice %224 {offsets = [0, 1], sizes = [2, 1], strides = [1, 1]} : vector<2x4xf32> to vector<2x1xf32>
    %233 = vector.broadcast %232 : vector<2x1xf32> to vector<2x16xf32>
    %234 = vector.broadcast %30 : vector<1x16xf32> to vector<2x16xf32>
    %235 = arith.mulf %233, %234 : vector<2x16xf32>
    %236 = arith.addf %231, %235 : vector<2x16xf32>
    %237 = vector.extract_strided_slice %224 {offsets = [0, 2], sizes = [2, 1], strides = [1, 1]} : vector<2x4xf32> to vector<2x1xf32>
    %238 = vector.broadcast %237 : vector<2x1xf32> to vector<2x16xf32>
    %239 = vector.broadcast %31 : vector<1x16xf32> to vector<2x16xf32>
    %240 = arith.mulf %238, %239 : vector<2x16xf32>
    %241 = arith.addf %236, %240 : vector<2x16xf32>
    %242 = vector.extract_strided_slice %224 {offsets = [0, 3], sizes = [2, 1], strides = [1, 1]} : vector<2x4xf32> to vector<2x1xf32>
    %243 = vector.broadcast %242 : vector<2x1xf32> to vector<2x16xf32>
    %244 = vector.broadcast %32 : vector<1x16xf32> to vector<2x16xf32>
    %245 = arith.mulf %243, %244 : vector<2x16xf32>
    %246 = arith.addf %241, %245 : vector<2x16xf32>
    %247 = vector.extract_strided_slice %246 {offsets = [0, 0], sizes = [2, 12], strides = [1, 1]} : vector<2x16xf32> to vector<2x12xf32>
    %248 = arith.negf %247 : vector<2x12xf32>
    %249 = math.exp %248 : vector<2x12xf32>
    %cst_15 = arith.constant 1.000000e+00 : f32
    %250 = vector.broadcast %cst_15 : f32 to vector<2x12xf32>
    %251 = arith.addf %250, %249 : vector<2x12xf32>
    %252 = arith.divf %250, %251 : vector<2x12xf32>
    %253 = vector.extract_strided_slice %246 {offsets = [0, 12], sizes = [2, 4], strides = [1, 1]} : vector<2x16xf32> to vector<2x4xf32>
    %254 = math.tanh %253 : vector<2x4xf32>
    %255 = vector.extract_strided_slice %252 {offsets = [0, 4], sizes = [2, 4], strides = [1, 1]} : vector<2x12xf32> to vector<2x4xf32>
    %256 = arith.mulf %255, %221 : vector<2x4xf32>
    %257 = vector.extract_strided_slice %252 {offsets = [0, 0], sizes = [2, 4], strides = [1, 1]} : vector<2x12xf32> to vector<2x4xf32>
    %258 = arith.mulf %257, %254 : vector<2x4xf32>
    %259 = arith.addf %256, %258 : vector<2x4xf32>
    %260 = vector.extract_strided_slice %252 {offsets = [0, 8], sizes = [2, 4], strides = [1, 1]} : vector<2x12xf32> to vector<2x4xf32>
    %261 = math.tanh %259 : vector<2x4xf32>
    %262 = arith.mulf %260, %261 : vector<2x4xf32>
    %263 = vector.extract_strided_slice %28 {offsets = [0, 6, 0], sizes = [2, 1, 16], strides = [1, 1, 1]} : vector<2x8x16xf32> to vector<2x1x16xf32>
    %264 = vector.shape_cast %263 : vector<2x1x16xf32> to vector<2x16xf32>
    %265 = vector.extract_strided_slice %262 {offsets = [0, 0], sizes = [2, 1], strides = [1, 1]} : vector<2x4xf32> to vector<2x1xf32>
    %266 = vector.broadcast %265 : vector<2x1xf32> to vector<2x16xf32>
    %267 = vector.broadcast %29 : vector<1x16xf32> to vector<2x16xf32>
    %268 = arith.mulf %266, %267 : vector<2x16xf32>
    %269 = arith.addf %264, %268 : vector<2x16xf32>
    %270 = vector.extract_strided_slice %262 {offsets = [0, 1], sizes = [2, 1], strides = [1, 1]} : vector<2x4xf32> to vector<2x1xf32>
    %271 = vector.broadcast %270 : vector<2x1xf32> to vector<2x16xf32>
    %272 = vector.broadcast %30 : vector<1x16xf32> to vector<2x16xf32>
    %273 = arith.mulf %271, %272 : vector<2x16xf32>
    %274 = arith.addf %269, %273 : vector<2x16xf32>
    %275 = vector.extract_strided_slice %262 {offsets = [0, 2], sizes = [2, 1], strides = [1, 1]} : vector<2x4xf32> to vector<2x1xf32>
    %276 = vector.broadcast %275 : vector<2x1xf32> to vector<2x16xf32>
    %277 = vector.broadcast %31 : vector<1x16xf32> to vector<2x16xf32>
    %278 = arith.mulf %276, %277 : vector<2x16xf32>
    %279 = arith.addf %274, %278 : vector<2x16xf32>
    %280 = vector.extract_strided_slice %262 {offsets = [0, 3], sizes = [2, 1], strides = [1, 1]} : vector<2x4xf32> to vector<2x1xf32>
    %281 = vector.broadcast %280 : vector<2x1xf32> to vector<2x16xf32>
    %282 = vector.broadcast %32 : vector<1x16xf32> to vector<2x16xf32>
    %283 = arith.mulf %281, %282 : vector<2x16xf32>
    %284 = arith.addf %279, %283 : vector<2x16xf32>
    %285 = vector.extract_strided_slice %284 {offsets = [0, 0], sizes = [2, 12], strides = [1, 1]} : vector<2x16xf32> to vector<2x12xf32>
    %286 = arith.negf %285 : vector<2x12xf32>
    %287 = math.exp %286 : vector<2x12xf32>
    %cst_16 = arith.constant 1.000000e+00 : f32
    %288 = vector.broadcast %cst_16 : f32 to vector<2x12xf32>
    %289 = arith.addf %288, %287 : vector<2x12xf32>
    %290 = arith.divf %288, %289 : vector<2x12xf32>
    %291 = vector.extract_strided_slice %284 {offsets = [0, 12], sizes = [2, 4], strides = [1, 1]} : vector<2x16xf32> to vector<2x4xf32>
    %292 = math.tanh %291 : vector<2x4xf32>
    %293 = vector.extract_strided_slice %290 {offsets = [0, 4], sizes = [2, 4], strides = [1, 1]} : vector<2x12xf32> to vector<2x4xf32>
    %294 = arith.mulf %293, %259 : vector<2x4xf32>
    %295 = vector.extract_strided_slice %290 {offsets = [0, 0], sizes = [2, 4], strides = [1, 1]} : vector<2x12xf32> to vector<2x4xf32>
    %296 = arith.mulf %295, %292 : vector<2x4xf32>
    %297 = arith.addf %294, %296 : vector<2x4xf32>
    %298 = vector.extract_strided_slice %290 {offsets = [0, 8], sizes = [2, 4], strides = [1, 1]} : vector<2x12xf32> to vector<2x4xf32>
    %299 = math.tanh %297 : vector<2x4xf32>
    %300 = arith.mulf %298, %299 : vector<2x4xf32>
    %301 = vector.extract_strided_slice %28 {offsets = [0, 7, 0], sizes = [2, 1, 16], strides = [1, 1, 1]} : vector<2x8x16xf32> to vector<2x1x16xf32>
    %302 = vector.shape_cast %301 : vector<2x1x16xf32> to vector<2x16xf32>
    %303 = vector.extract_strided_slice %300 {offsets = [0, 0], sizes = [2, 1], strides = [1, 1]} : vector<2x4xf32> to vector<2x1xf32>
    %304 = vector.broadcast %303 : vector<2x1xf32> to vector<2x16xf32>
    %305 = vector.broadcast %29 : vector<1x16xf32> to vector<2x16xf32>
    %306 = arith.mulf %304, %305 : vector<2x16xf32>
    %307 = arith.addf %302, %306 : vector<2x16xf32>
    %308 = vector.extract_strided_slice %300 {offsets = [0, 1], sizes = [2, 1], strides = [1, 1]} : vector<2x4xf32> to vector<2x1xf32>
    %309 = vector.broadcast %308 : vector<2x1xf32> to vector<2x16xf32>
    %310 = vector.broadcast %30 : vector<1x16xf32> to vector<2x16xf32>
    %311 = arith.mulf %309, %310 : vector<2x16xf32>
    %312 = arith.addf %307, %311 : vector<2x16xf32>
    %313 = vector.extract_strided_slice %300 {offsets = [0, 2], sizes = [2, 1], strides = [1, 1]} : vector<2x4xf32> to vector<2x1xf32>
    %314 = vector.broadcast %313 : vector<2x1xf32> to vector<2x16xf32>
    %315 = vector.broadcast %31 : vector<1x16xf32> to vector<2x16xf32>
    %316 = arith.mulf %314, %315 : vector<2x16xf32>
    %317 = arith.addf %312, %316 : vector<2x16xf32>
    %318 = vector.extract_strided_slice %300 {offsets = [0, 3], sizes = [2, 1], strides = [1, 1]} : vector<2x4xf32> to vector<2x1xf32>
    %319 = vector.broadcast %318 : vector<2x1xf32> to vector<2x16xf32>
    %320 = vector.broadcast %32 : vector<1x16xf32> to vector<2x16xf32>
    %321 = arith.mulf %319, %320 : vector<2x16xf32>
    %322 = arith.addf %317, %321 : vector<2x16xf32>
    %323 = vector.extract_strided_slice %322 {offsets = [0, 0], sizes = [2, 12], strides = [1, 1]} : vector<2x16xf32> to vector<2x12xf32>
    %324 = arith.negf %323 : vector<2x12xf32>
    %325 = math.exp %324 : vector<2x12xf32>
    %cst_17 = arith.constant 1.000000e+00 : f32
    %326 = vector.broadcast %cst_17 : f32 to vector<2x12xf32>
    %327 = arith.addf %326, %325 : vector<2x12xf32>
    %328 = arith.divf %326, %327 : vector<2x12xf32>
    %329 = vector.extract_strided_slice %322 {offsets = [0, 12], sizes = [2, 4], strides = [1, 1]} : vector<2x16xf32> to vector<2x4xf32>
    %330 = math.tanh %329 : vector<2x4xf32>
    %331 = vector.extract_strided_slice %328 {offsets = [0, 4], sizes = [2, 4], strides = [1, 1]} : vector<2x12xf32> to vector<2x4xf32>
    %332 = arith.mulf %331, %297 : vector<2x4xf32>
    %333 = vector.extract_strided_slice %328 {offsets = [0, 0], sizes = [2, 4], strides = [1, 1]} : vector<2x12xf32> to vector<2x4xf32>
    %334 = arith.mulf %333, %330 : vector<2x4xf32>
    %335 = arith.addf %332, %334 : vector<2x4xf32>
    %336 = vector.extract_strided_slice %328 {offsets = [0, 8], sizes = [2, 4], strides = [1, 1]} : vector<2x12xf32> to vector<2x4xf32>
    %337 = math.tanh %335 : vector<2x4xf32>
    %338 = arith.mulf %336, %337 : vector<2x4xf32>
    %339 = vector.extract_strided_slice %2 {offsets = [0, 7, 0], sizes = [2, 1, 3], strides = [1, 1, 1]} : vector<2x8x3xf32> to vector<2x1x3xf32>
    %340 = vector.shape_cast %339 : vector<2x1x3xf32> to vector<2x3xf32>
    %c0_18 = arith.constant 0 : index
    %c0_19 = arith.constant 0 : index
    %341 = vector.load %arg5[%c0_18, %c0_19] : memref<3x16xf32, #tpu.memory_space<vmem>>, vector<3x16xf32>
    %342 = vector.extract_strided_slice %340 {offsets = [0, 0], sizes = [2, 1], strides = [1, 1]} : vector<2x3xf32> to vector<2x1xf32>
    %343 = vector.extract_strided_slice %341 {offsets = [0, 0], sizes = [1, 16], strides = [1, 1]} : vector<3x16xf32> to vector<1x16xf32>
    %344 = vector.broadcast %342 : vector<2x1xf32> to vector<2x16xf32>
    %345 = vector.broadcast %343 : vector<1x16xf32> to vector<2x16xf32>
    %346 = arith.mulf %344, %345 : vector<2x16xf32>
    %347 = vector.extract_strided_slice %340 {offsets = [0, 1], sizes = [2, 1], strides = [1, 1]} : vector<2x3xf32> to vector<2x1xf32>
    %348 = vector.extract_strided_slice %341 {offsets = [1, 0], sizes = [1, 16], strides = [1, 1]} : vector<3x16xf32> to vector<1x16xf32>
    %349 = vector.broadcast %347 : vector<2x1xf32> to vector<2x16xf32>
    %350 = vector.broadcast %348 : vector<1x16xf32> to vector<2x16xf32>
    %351 = arith.mulf %349, %350 : vector<2x16xf32>
    %352 = arith.addf %346, %351 : vector<2x16xf32>
    %353 = vector.extract_strided_slice %340 {offsets = [0, 2], sizes = [2, 1], strides = [1, 1]} : vector<2x3xf32> to vector<2x1xf32>
    %354 = vector.extract_strided_slice %341 {offsets = [2, 0], sizes = [1, 16], strides = [1, 1]} : vector<3x16xf32> to vector<1x16xf32>
    %355 = vector.broadcast %353 : vector<2x1xf32> to vector<2x16xf32>
    %356 = vector.broadcast %354 : vector<1x16xf32> to vector<2x16xf32>
    %357 = arith.mulf %355, %356 : vector<2x16xf32>
    %358 = arith.addf %352, %357 : vector<2x16xf32>
    %c0_20 = arith.constant 0 : index
    %c0_21 = arith.constant 0 : index
    %359 = vector.load %arg6[%c0_20, %c0_21] : memref<1x16xf32, #tpu.memory_space<vmem>>, vector<1x16xf32>
    %360 = vector.broadcast %359 : vector<1x16xf32> to vector<2x16xf32>
    %361 = arith.addf %358, %360 : vector<2x16xf32>
    %362 = vector.extract_strided_slice %361 {offsets = [0, 0], sizes = [2, 12], strides = [1, 1]} : vector<2x16xf32> to vector<2x12xf32>
    %363 = arith.negf %362 : vector<2x12xf32>
    %364 = math.exp %363 : vector<2x12xf32>
    %cst_22 = arith.constant 1.000000e+00 : f32
    %365 = vector.broadcast %cst_22 : f32 to vector<2x12xf32>
    %366 = arith.addf %365, %364 : vector<2x12xf32>
    %367 = arith.divf %365, %366 : vector<2x12xf32>
    %368 = vector.extract_strided_slice %361 {offsets = [0, 12], sizes = [2, 4], strides = [1, 1]} : vector<2x16xf32> to vector<2x4xf32>
    %369 = math.tanh %368 : vector<2x4xf32>
    %370 = vector.extract_strided_slice %367 {offsets = [0, 0], sizes = [2, 4], strides = [1, 1]} : vector<2x12xf32> to vector<2x4xf32>
    %371 = arith.mulf %370, %369 : vector<2x4xf32>
    %372 = vector.extract_strided_slice %367 {offsets = [0, 8], sizes = [2, 4], strides = [1, 1]} : vector<2x12xf32> to vector<2x4xf32>
    %373 = math.tanh %371 : vector<2x4xf32>
    %374 = arith.mulf %372, %373 : vector<2x4xf32>
    %c0_23 = arith.constant 0 : index
    %c0_24 = arith.constant 0 : index
    %375 = vector.load %arg7[%c0_23, %c0_24] : memref<4x2xf32, #tpu.memory_space<vmem>>, vector<4x2xf32>
    %c0_25 = arith.constant 0 : index
    %c0_26 = arith.constant 0 : index
    %376 = vector.load %arg8[%c0_25, %c0_26] : memref<4x2xf32, #tpu.memory_space<vmem>>, vector<4x2xf32>
    %377 = vector.extract_strided_slice %338 {offsets = [0, 0], sizes = [2, 1], strides = [1, 1]} : vector<2x4xf32> to vector<2x1xf32>
    %378 = vector.extract_strided_slice %375 {offsets = [0, 0], sizes = [1, 2], strides = [1, 1]} : vector<4x2xf32> to vector<1x2xf32>
    %379 = vector.broadcast %377 : vector<2x1xf32> to vector<2x2xf32>
    %380 = vector.broadcast %378 : vector<1x2xf32> to vector<2x2xf32>
    %381 = arith.mulf %379, %380 : vector<2x2xf32>
    %382 = vector.extract_strided_slice %338 {offsets = [0, 1], sizes = [2, 1], strides = [1, 1]} : vector<2x4xf32> to vector<2x1xf32>
    %383 = vector.extract_strided_slice %375 {offsets = [1, 0], sizes = [1, 2], strides = [1, 1]} : vector<4x2xf32> to vector<1x2xf32>
    %384 = vector.broadcast %382 : vector<2x1xf32> to vector<2x2xf32>
    %385 = vector.broadcast %383 : vector<1x2xf32> to vector<2x2xf32>
    %386 = arith.mulf %384, %385 : vector<2x2xf32>
    %387 = arith.addf %381, %386 : vector<2x2xf32>
    %388 = vector.extract_strided_slice %338 {offsets = [0, 2], sizes = [2, 1], strides = [1, 1]} : vector<2x4xf32> to vector<2x1xf32>
    %389 = vector.extract_strided_slice %375 {offsets = [2, 0], sizes = [1, 2], strides = [1, 1]} : vector<4x2xf32> to vector<1x2xf32>
    %390 = vector.broadcast %388 : vector<2x1xf32> to vector<2x2xf32>
    %391 = vector.broadcast %389 : vector<1x2xf32> to vector<2x2xf32>
    %392 = arith.mulf %390, %391 : vector<2x2xf32>
    %393 = arith.addf %387, %392 : vector<2x2xf32>
    %394 = vector.extract_strided_slice %338 {offsets = [0, 3], sizes = [2, 1], strides = [1, 1]} : vector<2x4xf32> to vector<2x1xf32>
    %395 = vector.extract_strided_slice %375 {offsets = [3, 0], sizes = [1, 2], strides = [1, 1]} : vector<4x2xf32> to vector<1x2xf32>
    %396 = vector.broadcast %394 : vector<2x1xf32> to vector<2x2xf32>
    %397 = vector.broadcast %395 : vector<1x2xf32> to vector<2x2xf32>
    %398 = arith.mulf %396, %397 : vector<2x2xf32>
    %399 = arith.addf %393, %398 : vector<2x2xf32>
    %400 = vector.extract_strided_slice %374 {offsets = [0, 0], sizes = [2, 1], strides = [1, 1]} : vector<2x4xf32> to vector<2x1xf32>
    %401 = vector.extract_strided_slice %376 {offsets = [0, 0], sizes = [1, 2], strides = [1, 1]} : vector<4x2xf32> to vector<1x2xf32>
    %402 = vector.broadcast %400 : vector<2x1xf32> to vector<2x2xf32>
    %403 = vector.broadcast %401 : vector<1x2xf32> to vector<2x2xf32>
    %404 = arith.mulf %402, %403 : vector<2x2xf32>
    %405 = arith.addf %399, %404 : vector<2x2xf32>
    %406 = vector.extract_strided_slice %374 {offsets = [0, 1], sizes = [2, 1], strides = [1, 1]} : vector<2x4xf32> to vector<2x1xf32>
    %407 = vector.extract_strided_slice %376 {offsets = [1, 0], sizes = [1, 2], strides = [1, 1]} : vector<4x2xf32> to vector<1x2xf32>
    %408 = vector.broadcast %406 : vector<2x1xf32> to vector<2x2xf32>
    %409 = vector.broadcast %407 : vector<1x2xf32> to vector<2x2xf32>
    %410 = arith.mulf %408, %409 : vector<2x2xf32>
    %411 = arith.addf %405, %410 : vector<2x2xf32>
    %412 = vector.extract_strided_slice %374 {offsets = [0, 2], sizes = [2, 1], strides = [1, 1]} : vector<2x4xf32> to vector<2x1xf32>
    %413 = vector.extract_strided_slice %376 {offsets = [2, 0], sizes = [1, 2], strides = [1, 1]} : vector<4x2xf32> to vector<1x2xf32>
    %414 = vector.broadcast %412 : vector<2x1xf32> to vector<2x2xf32>
    %415 = vector.broadcast %413 : vector<1x2xf32> to vector<2x2xf32>
    %416 = arith.mulf %414, %415 : vector<2x2xf32>
    %417 = arith.addf %411, %416 : vector<2x2xf32>
    %418 = vector.extract_strided_slice %374 {offsets = [0, 3], sizes = [2, 1], strides = [1, 1]} : vector<2x4xf32> to vector<2x1xf32>
    %419 = vector.extract_strided_slice %376 {offsets = [3, 0], sizes = [1, 2], strides = [1, 1]} : vector<4x2xf32> to vector<1x2xf32>
    %420 = vector.broadcast %418 : vector<2x1xf32> to vector<2x2xf32>
    %421 = vector.broadcast %419 : vector<1x2xf32> to vector<2x2xf32>
    %422 = arith.mulf %420, %421 : vector<2x2xf32>
    %423 = arith.addf %417, %422 : vector<2x2xf32>
    %c0_27 = arith.constant 0 : index
    %c0_28 = arith.constant 0 : index
    %424 = vector.load %arg9[%c0_27, %c0_28] : memref<1x2xf32, #tpu.memory_space<vmem>>, vector<1x2xf32>
    %425 = vector.broadcast %424 : vector<1x2xf32> to vector<2x2xf32>
    %426 = arith.addf %423, %425 : vector<2x2xf32>
    %c0_29 = arith.constant 0 : index
    %c0_30 = arith.constant 0 : index
    %427 = vector.load %arg10[%c0_29, %c0_30] : memref<2x2xf32, #tpu.memory_space<vmem>>, vector<2x2xf32>
    tpu.vector_store %arg10[%c0_29, %c0_30], %426 {strides = array<i32>} : memref<2x2xf32, #tpu.memory_space<vmem>>, vector<2x2xf32>,
    return
  }
  func.func @transform_0(%arg0: i32) -> (i32, i32, i32) {
    %c0_i32 = arith.constant 0 : i32
    %c0_i32_0 = arith.constant 0 : i32
    %c0_i32_1 = arith.constant 0 : i32
    %c0_i32_2 = arith.constant 0 : i32
    return %c0_i32, %c0_i32_0, %c0_i32_1 : i32, i32, i32
  }
  func.func @transform_1(%arg0: i32) -> (i32, i32) {
    %c0_i32 = arith.constant 0 : i32
    %c0_i32_0 = arith.constant 0 : i32
    %c0_i32_1 = arith.constant 0 : i32
    return %c0_i32, %c0_i32_0 : i32, i32
  }
  func.func @transform_2(%arg0: i32) -> (i32, i32) {
    %c0_i32 = arith.constant 0 : i32
    %c0_i32_0 = arith.constant 0 : i32
    %c0_i32_1 = arith.constant 0 : i32
    return %c0_i32, %c0_i32_0 : i32, i32
  }
  func.func @transform_3(%arg0: i32) -> (i32, i32) {
    %c0_i32 = arith.constant 0 : i32
    %c0_i32_0 = arith.constant 0 : i32
    %c0_i32_1 = arith.constant 0 : i32
    return %c0_i32, %c0_i32_0 : i32, i32
  }
  func.func @transform_4(%arg0: i32) -> (i32, i32) {
    %c0_i32 = arith.constant 0 : i32
    %c0_i32_0 = arith.constant 0 : i32
    %c0_i32_1 = arith.constant 0 : i32
    return %c0_i32, %c0_i32_0 : i32, i32
  }
  func.func @transform_5(%arg0: i32) -> (i32, i32) {
    %c0_i32 = arith.constant 0 : i32
    %c0_i32_0 = arith.constant 0 : i32
    %c0_i32_1 = arith.constant 0 : i32
    return %c0_i32, %c0_i32_0 : i32, i32
  }
  func.func @transform_6(%arg0: i32) -> (i32, i32) {
    %c0_i32 = arith.constant 0 : i32
    %c0_i32_0 = arith.constant 0 : i32
    %c0_i32_1 = arith.constant 0 : i32
    return %c0_i32, %c0_i32_0 : i32, i32
  }
  func.func @transform_7(%arg0: i32) -> (i32, i32) {
    %c0_i32 = arith.constant 0 : i32
    %c0_i32_0 = arith.constant 0 : i32
    %c0_i32_1 = arith.constant 0 : i32
    return %c0_i32, %c0_i32_0 : i32, i32
  }
  func.func @transform_8(%arg0: i32) -> (i32, i32) {
    %c0_i32 = arith.constant 0 : i32
    %c0_i32_0 = arith.constant 0 : i32
    %c0_i32_1 = arith.constant 0 : i32
    return %c0_i32, %c0_i32_0 : i32, i32
  }
  func.func @transform_9(%arg0: i32) -> (i32, i32) {
    %c0_i32 = arith.constant 0 : i32
    %c0_i32_0 = arith.constant 0 : i32
    %c0_i32_1 = arith.constant 0 : i32
    return %c0_i32, %c0_i32_0 : i32, i32
  }
}

</mosaic_0001>

<bundles_post_ra>
// kernel: tpu_custom_call.1
= control target key start
LH: loop header
LB: loop body
LE: loop exit
PB: predicated region body
PF: predicated region fallthrough
CT: control target
= control target key end

     0   :  { %v1568_v2 = vmov 0   ;;  %s1977_s0 = inlined_call_operand.vmem [shape: f32[2,8,3], index: 0, kind: input, shape index: {}]   ;;  %s1978_s1 = inlined_call_operand.vmem [shape: f32[3,16], index: 1, kind: input, shape index: {}]   ;;  %s1979_s2 = inlined_call_operand.vmem [shape: f32[4,16], index: 2, kind: input, shape index: {}]   ;;  %s1980_s3 = inlined_call_operand.vmem [shape: f32[1,16], index: 3, kind: input, shape index: {}]   ;;  %s1981_s4 = inlined_call_operand.vmem [shape: f32[3,16], index: 4, kind: input, shape index: {}]   ;;  %s1982_s5 = inlined_call_operand.vmem [shape: f32[1,16], index: 5, kind: input, shape index: {}]   ;;  %s1983_s6 = inlined_call_operand.vmem [shape: f32[4,2], index: 6, kind: input, shape index: {}]   ;;  %s1984_s7 = inlined_call_operand.vmem [shape: f32[4,2], index: 7, kind: input, shape index: {}]   ;;  %s1985_s8 = inlined_call_operand.vmem [shape: f32[1,2], index: 8, kind: input, shape index: {}]   ;;  %s1986_s9 = inlined_call_operand.hbm [shape: f32[2,2], index: 9, kind: output, shape index: {}]  }
   0x1   :  { %v34_v0 = vld [vmem:[%s1977_s0 + $0x8] sm:$0xff]  ;;  %v33_v1 = vld [vmem:[%s1977_s0] sm:$0xff]  ;;  %1334 = vset.pattern.permute.xlu1 %v1568_v2  ;;  %1332 = vset.pattern.permute.xlu0 %v1568_v2 }
   0x2   :  { %v36_v3 = vmax.f32 %v34_v0, 0.0  ;;  %v35_v4 = vmax.f32 %v33_v1, 0.0 }
   0x3   :  { %14 = vsyncpa [#allocation3], 0  ;;  %v1569_v5 = vmov 1   ;;  %v1570_v6 = vmov 2   ;;  %v50_v7 = vlaneseq  ;;  %v37_v13 = vld [vmem:[%s1978_s1] sm:$0x7] }
   0x4   :  { %47 = vperm.xlu0 %1332, %v36_v3   ;;  %42 = vperm.xlu1 %1334, %v35_v4   ;;  %v38_v19 = vld [vmem:[%s1979_s2] sm:$0xf]  ;;  %s1572_s16 = smov 4   ;;  %vm1284_vm0 = vcmask 8192   ;;  %s1578_s24 = smov [#allocation2]   ;;  %vm1282_vm1 = vcmask 15367  }
   0x5   :  { %v51_v8 = vshrl.u32 %v50_v7, 7  ;;  %v1300_v34 = vld [vmem:[%s1980_s3] ss:$0 sm:$0xff]  ;;  %s1571_s3 = smov 116   ;;  %s1292_s25 = sshll.u32 %s1578_s24, 4  ;;  %s1293_s25 = int_to_ptr.vmem [resolvable:$true] %s1292_s25 }
   0x6   :  { %s1544_s26 = scalar_lea.vmem %s1293_s25, 32  ;;  %p1549_p1 = scmp.lt.s32.totalorder %s1293_s25, %s1293_s25 }
   0x7   :  { %v1635_v9 = vsub.s32 1, %v51_v8  ;;  %v1641_v12 = vsub.s32 0, %v51_v8  ;;  %v1647_v15 = vsub.s32 2, %v51_v8  ;;  %v1665_v26 = vsub.s32 3, %v51_v8  ;;  %p1545_p0 = scmp.ne.s32.totalorder %s1293_s25, %s1544_s26  ;;  %p1550_p2 = scmp.lt.s32.totalorder %s1544_s26, %s1544_s26 }
   0x8   :  { %1333 = vset.pattern.permute.xlu0 %v1569_v5  ;;  %1335 = vset.pattern.permute.xlu1 %v1569_v5 }
   0x9   :  { %61 = vperm.xlu0 %1333, %v36_v3   ;;  %57 = vperm.xlu1 %1335, %v35_v4   ;;  %v67_v14 = vrot.slane %v37_v13, %v1635_v9  ;;  %v53_v16 = vrot.slane %v37_v13, %v1641_v12  ;;  %v83_v22 = vrot.slane %v37_v13, %v1647_v15  ;;  %p1551_p3 = por %p1550_p2, %p1549_p1 }
   0xa   :  { %v1661_v23 = vrot.slane %v38_v19, %v1641_v12  ;;  %v1668_v27 = vrot.slane %v38_v19, %v1635_v9  ;;  %v1680_v35 = vrot.slane %v38_v19, %v1647_v15  ;;  %v1684_v39 = vrot.slane %v38_v19, %v1665_v26 }
   0xb   :  { %p1552_p4 = pnand %p1551_p3, %p1545_p0 }
   0xc   :  { %v100_v38 = vmul.f32 0.0, %v1661_v23  ;;  %v107_v42 = vmul.f32 0.0, %v1668_v27  ;;  %v114_v44 = vmul.f32 0.0, %v1680_v35  ;;  %v121_v47 = vmul.f32 0.0, %v1684_v39 }
   0xd   :  { %1337 = vset.pattern.permute.xlu0 %v1570_v6  ;;  %1336 = vset.pattern.permute.xlu1 %v1570_v6  ;;  %v1573_v6 = vmov 8  }
   0xe   :  { %73 = vperm.xlu0 %1337, %v35_v4   ;;  %77 = vperm.xlu1 %1336, %v36_v3  }
  0x12   :  { %1338 = vset.pattern.permute.xlu0 %v1573_v6  ;;  %1339 = vset.pattern.permute.xlu1 %v1573_v6 }
  0x83   :  { %v1637_v10 = vpop.permute.xlu1 %42  ;;  %v1639_v11 = vpop.permute.xlu0 %47 }
  0x84   :  { %v54_v24 = vmul.f32 %v53_v16, %v1637_v10  ;;  %v55_v25 = vmul.f32 %v53_v16, %v1639_v11 }
  0x88   :  { %v1650_v17 = vpop.permute.xlu0 %61  ;;  %v1652_v18 = vpop.permute.xlu1 %57 }
  0x89   :  { %v69_v20 = vmul.f32 %v67_v14, %v1650_v17  ;;  %v68_v21 = vmul.f32 %v67_v14, %v1652_v18 }
  0x8b   :  { %v71_v30 = vadd.f32 %v69_v20, %v55_v25  ;;  %v70_v31 = vadd.f32 %v68_v21, %v54_v24  ;;  %v1574_v24 = vmov 9   ;;  %v1575_v25 = vmov 11  }
  0x8d   :  { %v1670_v28 = vpop.permute.xlu0 %73  ;;  %v1672_v29 = vpop.permute.xlu1 %77 }
  0x8e   :  { %v84_v32 = vmul.f32 %v83_v22, %v1670_v28  ;;  %v85_v33 = vmul.f32 %v83_v22, %v1672_v29 }
  0x90   :  { %v86_v36 = vadd.f32 %v84_v32, %v70_v31  ;;  %v87_v37 = vadd.f32 %v85_v33, %v71_v30  ;;  %v1576_v30 = vmov 10  }
  0x92   :  { %v1686_v40 = vadd.f32 %v1300_v34, %v86_v36  ;;  %v1688_v41 = vadd.f32 %v1300_v34, %v87_v37 }
  0x94   :  { %v102_v43 = vadd.f32 %v100_v38, %v1688_v41  ;;  %v101_v45 = vadd.f32 %v100_v38, %v1686_v40 }
  0x96   :  { %v109_v46 = vadd.f32 %v107_v42, %v102_v43  ;;  %v108_v48 = vadd.f32 %v107_v42, %v101_v45 }
  0x98   :  { %v116_v49 = vadd.f32 %v114_v44, %v109_v46  ;;  %v115_v50 = vadd.f32 %v114_v44, %v108_v48 }
  0x9a   :  { %v123_v51 = vadd.f32 %v121_v47, %v116_v49  ;;  %v122_v52 = vadd.f32 %v121_v47, %v115_v50 }
  0x9c   :  { %1400 = vtanh.f32 %v123_v51  ;;  %v1302_v55 = vmul.f32 -1.442695, %v123_v51  ;;  %v1301_v56 = vmul.f32 -1.442695, %v122_v52 }
  0x9d   :  { %1402 = vtanh.f32 %v122_v52 }
  0x9e   :  { %1404 = vpow2.f32 %v1302_v55 }
  0x9f   :  { %1406 = vpow2.f32 %v1301_v56 }
  0xa6   :  { %v1401_v53 = vpop.eup %1400 }
  0xa7   :  { %144 = vrot.lane.b32.xlu1 %v1401_v53, %s1571_s3  ;;  %v1403_v54 = vpop.eup %1402 }
  0xa8   :  { %v1405_v57 = vpop.eup %1404 }
  0xa9   :  { %v131_v58 = vadd.f32 1.0, %v1405_v57  ;;  %v1407_v59 = vpop.eup %1406 }
  0xaa   :  { %v130_v60 = vadd.f32 1.0, %v1407_v59 }
  0xab   :  { %142 = vrot.lane.b32.xlu1 %v1403_v54, %s1571_s3  ;;  %1408 = vrcp.f32 %v131_v58 }
  0xac   :  { %1410 = vrcp.f32 %v130_v60 }
  0xb5   :  { %v1409_v61 = vpop.eup %1408 }
  0xb6   :  { %v1411_v0 = vpop.eup %1410  ;;  %v139_v3 = vmul.f32 0.0, %v1409_v61 }
  0xb7   :  { %v138_v7 = vmul.f32 0.0, %v1411_v0 }
 0x119   :  { %v145_v62 = vpop.permute.xlu1 %144 }
 0x11a   :  { %v149_v63 = vmul.f32 %v1409_v61, %v145_v62 }
 0x11c   :  { %154 = vrot.lane.b32.xlu0 %v149_v63, %s1572_s16 }
 0x11d   :  { %v143_v1 = vpop.permute.xlu1 %142 }
 0x11e   :  { %v148_v2 = vmul.f32 %v1411_v0, %v143_v1 }
 0x120   :  { %152 = vrot.lane.b32.xlu1 %v148_v2, %s1572_s16 }
 0x18e   :  { %v155_v4 = vpop.permute.xlu0 %154 }
 0x18f   :  { %v1699_v5 = vadd.f32 %v155_v4, %v139_v3 }
 0x191   :  { %1412 = vtanh.f32 %v1699_v5 }
 0x192   :  { %v153_v8 = vpop.permute.xlu1 %152 }
 0x193   :  { %v1704_v13 = vadd.f32 %v153_v8, %v138_v7 }
 0x195   :  { %1414 = vtanh.f32 %v1704_v13 }
 0x19b   :  { %v1413_v14 = vpop.eup %1412 }
 0x19c   :  { %166 = vrot.lane.b32.xlu0 %v1413_v14, %s1572_s16 }
 0x19f   :  { %v1415_v16 = vpop.eup %1414 }
 0x1a0   :  { %164 = vrot.lane.b32.xlu1 %v1415_v16, %s1572_s16 }
 0x20e   :  { %v167_v19 = vpop.permute.xlu0 %166 }
 0x20f   :  { %v171_v20 = vmul.f32 %v1409_v61, %v167_v19 }
 0x211   :  { %179 = vperm.xlu0 %1338, %v171_v20  }
 0x212   :  { %v165_v21 = vpop.permute.xlu1 %164 }
 0x213   :  { %v170_v22 = vmul.f32 %v1411_v0, %v165_v21 }
 0x215   :  { %174 = vperm.xlu1 %1339, %v170_v22   ;;  %1341 = vset.pattern.permute.xlu0 %v1574_v24 }
 0x216   :  { %193 = vperm.xlu0 %1341, %v170_v22  }
 0x219   :  { %1340 = vset.pattern.permute.xlu1 %v1574_v24 }
 0x21a   :  { %197 = vperm.xlu1 %1340, %v171_v20   ;;  %1343 = vset.pattern.permute.xlu0 %v1575_v25 }
 0x21b   :  { %233 = vperm.xlu0 %1343, %v171_v20  }
 0x21e   :  { %1342 = vset.pattern.permute.xlu1 %v1576_v30 }
 0x21f   :  { %215 = vperm.xlu1 %1342, %v171_v20   ;;  %1346 = vset.pattern.permute.xlu0 %v1573_v6 }
 0x223   :  { %211 = vperm.xlu1 %1342, %v170_v22  }
 0x227   :  { %1344 = vset.pattern.permute.xlu1 %v1575_v25 }
 0x228   :  { %229 = vperm.xlu1 %1344, %v170_v22  }
 0x22c   :  { %1345 = vset.pattern.permute.xlu1 %v1573_v6 }
 0x290   :  { %v180_v31 = vpop.permute.xlu0 %179 }
 0x291   :  { %v183_v34 = vmul.f32 %v180_v31, %v1661_v23 }
 0x293   :  { %v187_v38 = vrot.slane %v183_v34, 7 }
 0x294   :  { %v175_v32 = vpop.permute.xlu1 %174 }
 0x295   :  { %v194_v33 = vpop.permute.xlu0 %193  ;;  %v182_v42 = vmul.f32 %v175_v32, %v1661_v23  ;;  %v191_v46 = vadd.f32 %v187_v38, %v1688_v41 }
 0x296   :  { %v200_v50 = vmul.f32 %v194_v33, %v1668_v27 }
 0x297   :  { %v186_v49 = vrot.slane %v182_v42, 7 }
 0x298   :  { %v204_v58 = vrot.slane %v200_v50, 7 }
 0x299   :  { %v198_v36 = vpop.permute.xlu1 %197  ;;  %v190_v57 = vadd.f32 %v186_v49, %v1686_v40 }
 0x29a   :  { %v201_v37 = vmul.f32 %v198_v36, %v1668_v27  ;;  %v234_v43 = vpop.permute.xlu0 %233  ;;  %v263_v36 = vrot.slane %v1699_v5, 7 }
 0x29b   :  { %v237_v47 = vmul.f32 %v234_v43, %v1684_v39  ;;  %v208_v62 = vadd.f32 %v204_v58, %v190_v57  ;;  %v262_v43 = vrot.slane %v1704_v13, 7 }
 0x29c   :  { %v205_v44 = vrot.slane %v201_v37, 7 }
 0x29d   :  { %v241_v54 = vrot.slane %v237_v47, 7 }
 0x29e   :  { %v216_v45 = vpop.permute.xlu1 %215  ;;  %v209_v51 = vadd.f32 %v205_v44, %v191_v46 }
 0x29f   :  { %v219_v48 = vmul.f32 %v216_v45, %v1680_v35 }
 0x2a1   :  { %v223_v52 = vrot.slane %v219_v48, 7 }
 0x2a2   :  { %v212_v53 = vpop.permute.xlu1 %211 }
 0x2a3   :  { %v227_v55 = vadd.f32 %v223_v52, %v209_v51  ;;  %v218_v56 = vmul.f32 %v212_v53, %v1680_v35 }
 0x2a5   :  { %v245_v59 = vadd.f32 %v241_v54, %v227_v55  ;;  %v222_v60 = vrot.slane %v218_v56, 7 }
 0x2a7   :  { %1416 = vtanh.f32 %v245_v59  ;;  %v230_v61 = vpop.permute.xlu1 %229  ;;  %v226_v0 = vadd.f32 %v222_v60, %v208_v62  ;;  %v1304_v7 = vmul.f32 -1.442695, %v245_v59 }
 0x2a8   :  { %v236_v63 = vmul.f32 %v230_v61, %v1684_v39 }
 0x2aa   :  { %v240_v1 = vrot.slane %v236_v63, 7 }
 0x2ac   :  { %v244_v2 = vadd.f32 %v240_v1, %v226_v0 }
 0x2ae   :  { %1418 = vtanh.f32 %v244_v2  ;;  %v1303_v8 = vmul.f32 -1.442695, %v244_v2 }
 0x2af   :  { %1420 = vpow2.f32 %v1304_v7 }
 0x2b0   :  { %1422 = vpow2.f32 %v1303_v8 }
 0x2b1   :  { %v1417_v3 = vpop.eup %1416 }
 0x2b2   :  { %272 = vrot.lane.b32.xlu1 %v1417_v3, %s1571_s3 }
 0x2b8   :  { %v1419_v4 = vpop.eup %1418 }
 0x2b9   :  { %270 = vrot.lane.b32.xlu0 %v1419_v4, %s1571_s3  ;;  %v1421_v14 = vpop.eup %1420 }
 0x2ba   :  { %v253_v16 = vadd.f32 1.0, %v1421_v14  ;;  %v1423_v19 = vpop.eup %1422 }
 0x2bb   :  { %v252_v20 = vadd.f32 1.0, %v1423_v19 }
 0x2bc   :  { %1424 = vrcp.f32 %v253_v16 }
 0x2bd   :  { %1426 = vrcp.f32 %v252_v20 }
 0x2c6   :  { %v1425_v21 = vpop.eup %1424 }
 0x2c7   :  { %v1427_v32 = vpop.eup %1426  ;;  %v267_v37 = vmul.f32 %v1425_v21, %v263_v36 }
 0x2c8   :  { %v266_v44 = vmul.f32 %v1427_v32, %v262_v43 }
 0x324   :  { %v273_v22 = vpop.permute.xlu1 %272 }
 0x325   :  { %v277_v31 = vmul.f32 %v1425_v21, %v273_v22 }
 0x327   :  { %282 = vrot.lane.b32.xlu1 %v277_v31, %s1572_s16 }
 0x32b   :  { %v271_v33 = vpop.permute.xlu0 %270 }
 0x32c   :  { %v276_v34 = vmul.f32 %v1427_v32, %v271_v33 }
 0x32e   :  { %280 = vrot.lane.b32.xlu0 %v276_v34, %s1572_s16 }
 0x399   :  { %v283_v38 = vpop.permute.xlu1 %282 }
 0x39a   :  { %v1731_v42 = vadd.f32 %v283_v38, %v267_v37 }
 0x39c   :  { %1428 = vtanh.f32 %v1731_v42 }
 0x3a0   :  { %v281_v45 = vpop.permute.xlu0 %280 }
 0x3a1   :  { %v1735_v46 = vadd.f32 %v281_v45, %v266_v44 }
 0x3a3   :  { %1430 = vtanh.f32 %v1735_v46 }
 0x3a6   :  { %v1429_v47 = vpop.eup %1428 }
 0x3a7   :  { %294 = vrot.lane.b32.xlu1 %v1429_v47, %s1572_s16 }
 0x3ad   :  { %v1431_v48 = vpop.eup %1430 }
 0x3ae   :  { %292 = vrot.lane.b32.xlu0 %v1431_v48, %s1572_s16 }
 0x419   :  { %v295_v5 = vpop.permute.xlu1 %294 }
 0x41a   :  { %v299_v49 = vmul.f32 %v1425_v21, %v295_v5 }
 0x41c   :  { %307 = vperm.xlu1 %1345, %v299_v49  }
 0x420   :  { %1347 = vset.pattern.permute.xlu1 %v1574_v24  ;;  %v293_v50 = vpop.permute.xlu0 %292 }
 0x421   :  { %v298_v51 = vmul.f32 %v1427_v32, %v293_v50  ;;  %325 = vperm.xlu1 %1347, %v299_v49  }
 0x423   :  { %302 = vperm.xlu0 %1346, %v298_v51  }
 0x425   :  { %321 = vperm.xlu1 %1347, %v298_v51  }
 0x427   :  { %1348 = vset.pattern.permute.xlu0 %v1576_v30 }
 0x428   :  { %343 = vperm.xlu0 %1348, %v299_v49  }
 0x429   :  { %1349 = vset.pattern.permute.xlu1 %v1576_v30 }
 0x42a   :  { %339 = vperm.xlu1 %1349, %v298_v51  }
 0x42c   :  { %1351 = vset.pattern.permute.xlu0 %v1575_v25 }
 0x42d   :  { %357 = vperm.xlu0 %1351, %v298_v51  }
 0x42e   :  { %1350 = vset.pattern.permute.xlu1 %v1575_v25 }
 0x42f   :  { %361 = vperm.xlu1 %1350, %v299_v49  }
 0x431   :  { %1352 = vset.pattern.permute.xlu0 %v1573_v6 }
 0x433   :  { %1353 = vset.pattern.permute.xlu1 %v1573_v6 }
 0x49b   :  { %v308_v13 = vpop.permute.xlu1 %307 }
 0x49c   :  { %v311_v56 = vmul.f32 %v308_v13, %v1661_v23 }
 0x49e   :  { %v315_v61 = vrot.slane %v311_v56, 7 }
 0x4a0   :  { %v326_v52 = vpop.permute.xlu1 %325  ;;  %v319_v7 = vadd.f32 %v315_v61, %v1688_v41 }
 0x4a1   :  { %v329_v57 = vmul.f32 %v326_v52, %v1668_v27 }
 0x4a2   :  { %v303_v53 = vpop.permute.xlu0 %302 }
 0x4a3   :  { %v310_v54 = vmul.f32 %v303_v53, %v1661_v23  ;;  %v333_v1 = vrot.slane %v329_v57, 7 }
 0x4a4   :  { %v322_v55 = vpop.permute.xlu1 %321 }
 0x4a5   :  { %v314_v59 = vrot.slane %v310_v54, 7  ;;  %v328_v60 = vmul.f32 %v322_v55, %v1668_v27  ;;  %v337_v20 = vadd.f32 %v333_v1, %v319_v7  ;;  %v391_v55 = vrot.slane %v1731_v42, 7 }
 0x4a7   :  { %v344_v58 = vpop.permute.xlu0 %343  ;;  %v318_v2 = vadd.f32 %v314_v59, %v1686_v40  ;;  %v332_v3 = vrot.slane %v328_v60, 7 }
 0x4a8   :  { %v347_v62 = vmul.f32 %v344_v58, %v1680_v35  ;;  %v390_v58 = vrot.slane %v1735_v46, 7 }
 0x4a9   :  { %v340_v63 = vpop.permute.xlu1 %339  ;;  %v336_v22 = vadd.f32 %v332_v3, %v318_v2 }
 0x4aa   :  { %v346_v0 = vmul.f32 %v340_v63, %v1680_v35  ;;  %v351_v8 = vrot.slane %v347_v62, 7 }
 0x4ac   :  { %v358_v4 = vpop.permute.xlu0 %357  ;;  %v350_v14 = vrot.slane %v346_v0, 7  ;;  %v355_v31 = vadd.f32 %v351_v8, %v337_v20 }
 0x4ad   :  { %v364_v16 = vmul.f32 %v358_v4, %v1684_v39 }
 0x4ae   :  { %v362_v19 = vpop.permute.xlu1 %361  ;;  %v354_v33 = vadd.f32 %v350_v14, %v336_v22 }
 0x4af   :  { %v365_v21 = vmul.f32 %v362_v19, %v1684_v39  ;;  %v368_v34 = vrot.slane %v364_v16, 7 }
 0x4b1   :  { %v369_v32 = vrot.slane %v365_v21, 7  ;;  %v372_v37 = vadd.f32 %v368_v34, %v354_v33 }
 0x4b3   :  { %v373_v36 = vadd.f32 %v369_v32, %v355_v31  ;;  %v1305_v45 = vmul.f32 -1.442695, %v372_v37 }
 0x4b5   :  { %1432 = vtanh.f32 %v373_v36  ;;  %v1306_v44 = vmul.f32 -1.442695, %v373_v36 }
 0x4b6   :  { %1434 = vtanh.f32 %v372_v37 }
 0x4b7   :  { %1436 = vpow2.f32 %v1306_v44 }
 0x4b8   :  { %1438 = vpow2.f32 %v1305_v45 }
 0x4bf   :  { %v1433_v38 = vpop.eup %1432 }
 0x4c0   :  { %400 = vrot.lane.b32.xlu1 %v1433_v38, %s1571_s3  ;;  %v1435_v43 = vpop.eup %1434 }
 0x4c1   :  { %v1437_v47 = vpop.eup %1436 }
 0x4c2   :  { %v381_v48 = vadd.f32 1.0, %v1437_v47  ;;  %v1439_v5 = vpop.eup %1438 }
 0x4c3   :  { %v380_v49 = vadd.f32 1.0, %v1439_v5 }
 0x4c4   :  { %398 = vrot.lane.b32.xlu1 %v1435_v43, %s1571_s3  ;;  %1440 = vrcp.f32 %v381_v48 }
 0x4c5   :  { %1442 = vrcp.f32 %v380_v49 }
 0x4ce   :  { %v1441_v50 = vpop.eup %1440 }
 0x4cf   :  { %v1443_v52 = vpop.eup %1442  ;;  %v395_v56 = vmul.f32 %v1441_v50, %v391_v55 }
 0x4d0   :  { %v394_v60 = vmul.f32 %v1443_v52, %v390_v58 }
 0x532   :  { %v401_v51 = vpop.permute.xlu1 %400 }
 0x533   :  { %v405_v13 = vmul.f32 %v1441_v50, %v401_v51 }
 0x535   :  { %410 = vrot.lane.b32.xlu0 %v405_v13, %s1572_s16 }
 0x536   :  { %v399_v53 = vpop.permute.xlu1 %398 }
 0x537   :  { %v404_v54 = vmul.f32 %v1443_v52, %v399_v53 }
 0x539   :  { %408 = vrot.lane.b32.xlu1 %v404_v54, %s1572_s16 }
 0x5a7   :  { %v411_v57 = vpop.permute.xlu0 %410 }
 0x5a8   :  { %v1763_v59 = vadd.f32 %v411_v57, %v395_v56 }
 0x5aa   :  { %1444 = vtanh.f32 %v1763_v59 }
 0x5ab   :  { %v409_v61 = vpop.permute.xlu1 %408 }
 0x5ac   :  { %v1766_v62 = vadd.f32 %v409_v61, %v394_v60 }
 0x5ae   :  { %1446 = vtanh.f32 %v1766_v62 }
 0x5b4   :  { %v1445_v63 = vpop.eup %1444 }
 0x5b5   :  { %422 = vrot.lane.b32.xlu0 %v1445_v63, %s1572_s16 }
 0x5b8   :  { %v1447_v0 = vpop.eup %1446 }
 0x5b9   :  { %420 = vrot.lane.b32.xlu1 %v1447_v0, %s1572_s16 }
 0x627   :  { %v423_v42 = vpop.permute.xlu0 %422 }
 0x628   :  { %v427_v1 = vmul.f32 %v1441_v50, %v423_v42 }
 0x62a   :  { %435 = vperm.xlu0 %1352, %v427_v1  }
 0x62b   :  { %v421_v46 = vpop.permute.xlu1 %420 }
 0x62c   :  { %v426_v2 = vmul.f32 %v1443_v52, %v421_v46 }
 0x62e   :  { %430 = vperm.xlu1 %1353, %v426_v2   ;;  %1355 = vset.pattern.permute.xlu0 %v1574_v24 }
 0x62f   :  { %449 = vperm.xlu0 %1355, %v426_v2  }
 0x632   :  { %1354 = vset.pattern.permute.xlu1 %v1574_v24 }
 0x633   :  { %453 = vperm.xlu1 %1354, %v427_v1   ;;  %1357 = vset.pattern.permute.xlu0 %v1575_v25 }
 0x634   :  { %489 = vperm.xlu0 %1357, %v427_v1  }
 0x637   :  { %1356 = vset.pattern.permute.xlu1 %v1576_v30 }
 0x638   :  { %471 = vperm.xlu1 %1356, %v427_v1   ;;  %1360 = vset.pattern.permute.xlu0 %v1573_v6 }
 0x63c   :  { %467 = vperm.xlu1 %1356, %v426_v2  }
 0x640   :  { %1358 = vset.pattern.permute.xlu1 %v1575_v25 }
 0x641   :  { %485 = vperm.xlu1 %1358, %v426_v2  }
 0x645   :  { %1359 = vset.pattern.permute.xlu1 %v1573_v6 }
 0x6a9   :  { %v436_v3 = vpop.permute.xlu0 %435 }
 0x6aa   :  { %v439_v8 = vmul.f32 %v436_v3, %v1661_v23 }
 0x6ac   :  { %v443_v19 = vrot.slane %v439_v8, 7 }
 0x6ad   :  { %v431_v4 = vpop.permute.xlu1 %430 }
 0x6ae   :  { %v450_v7 = vpop.permute.xlu0 %449  ;;  %v438_v20 = vmul.f32 %v431_v4, %v1661_v23  ;;  %v447_v32 = vadd.f32 %v443_v19, %v1688_v41 }
 0x6af   :  { %v456_v37 = vmul.f32 %v450_v7, %v1668_v27 }
 0x6b0   :  { %v442_v36 = vrot.slane %v438_v20, 7 }
 0x6b1   :  { %v460_v49 = vrot.slane %v456_v37, 7 }
 0x6b2   :  { %v454_v14 = vpop.permute.xlu1 %453  ;;  %v446_v5 = vadd.f32 %v442_v36, %v1686_v40 }
 0x6b3   :  { %v457_v16 = vmul.f32 %v454_v14, %v1668_v27  ;;  %v490_v21 = vpop.permute.xlu0 %489  ;;  %v519_v14 = vrot.slane %v1763_v59, 7 }
 0x6b4   :  { %v493_v33 = vmul.f32 %v490_v21, %v1684_v39  ;;  %v464_v52 = vadd.f32 %v460_v49, %v446_v5  ;;  %v518_v21 = vrot.slane %v1766_v62, 7 }
 0x6b5   :  { %v461_v22 = vrot.slane %v457_v16, 7 }
 0x6b6   :  { %v497_v45 = vrot.slane %v493_v33, 7 }
 0x6b7   :  { %v472_v31 = vpop.permute.xlu1 %471  ;;  %v465_v38 = vadd.f32 %v461_v22, %v447_v32 }
 0x6b8   :  { %v475_v34 = vmul.f32 %v472_v31, %v1680_v35 }
 0x6ba   :  { %v479_v43 = vrot.slane %v475_v34, 7 }
 0x6bb   :  { %v468_v44 = vpop.permute.xlu1 %467 }
 0x6bc   :  { %v483_v47 = vadd.f32 %v479_v43, %v465_v38  ;;  %v474_v48 = vmul.f32 %v468_v44, %v1680_v35 }
 0x6be   :  { %v501_v50 = vadd.f32 %v497_v45, %v483_v47  ;;  %v478_v51 = vrot.slane %v474_v48, 7 }
 0x6c0   :  { %1448 = vtanh.f32 %v501_v50  ;;  %v486_v13 = vpop.permute.xlu1 %485  ;;  %v482_v54 = vadd.f32 %v478_v51, %v464_v52  ;;  %v1308_v60 = vmul.f32 -1.442695, %v501_v50 }
 0x6c1   :  { %v492_v53 = vmul.f32 %v486_v13, %v1684_v39 }
 0x6c3   :  { %v496_v55 = vrot.slane %v492_v53, 7 }
 0x6c5   :  { %v500_v56 = vadd.f32 %v496_v55, %v482_v54 }
 0x6c7   :  { %1450 = vtanh.f32 %v500_v56  ;;  %v1307_v61 = vmul.f32 -1.442695, %v500_v56 }
 0x6c8   :  { %1452 = vpow2.f32 %v1308_v60 }
 0x6c9   :  { %1454 = vpow2.f32 %v1307_v61 }
 0x6ca   :  { %v1449_v57 = vpop.eup %1448 }
 0x6cb   :  { %528 = vrot.lane.b32.xlu1 %v1449_v57, %s1571_s3 }
 0x6d1   :  { %v1451_v58 = vpop.eup %1450 }
 0x6d2   :  { %526 = vrot.lane.b32.xlu0 %v1451_v58, %s1571_s3  ;;  %v1453_v63 = vpop.eup %1452 }
 0x6d3   :  { %v509_v0 = vadd.f32 1.0, %v1453_v63  ;;  %v1455_v42 = vpop.eup %1454 }
 0x6d4   :  { %v508_v1 = vadd.f32 1.0, %v1455_v42 }
 0x6d5   :  { %1456 = vrcp.f32 %v509_v0 }
 0x6d6   :  { %1458 = vrcp.f32 %v508_v1 }
 0x6df   :  { %v1457_v46 = vpop.eup %1456 }
 0x6e0   :  { %v1459_v4 = vpop.eup %1458  ;;  %v523_v16 = vmul.f32 %v1457_v46, %v519_v14 }
 0x6e1   :  { %v522_v22 = vmul.f32 %v1459_v4, %v518_v21 }
 0x73d   :  { %v529_v2 = vpop.permute.xlu1 %528 }
 0x73e   :  { %v533_v3 = vmul.f32 %v1457_v46, %v529_v2 }
 0x740   :  { %538 = vrot.lane.b32.xlu1 %v533_v3, %s1572_s16 }
 0x744   :  { %v527_v7 = vpop.permute.xlu0 %526 }
 0x745   :  { %v532_v8 = vmul.f32 %v1459_v4, %v527_v7 }
 0x747   :  { %536 = vrot.lane.b32.xlu0 %v532_v8, %s1572_s16 }
 0x7b2   :  { %v539_v19 = vpop.permute.xlu1 %538 }
 0x7b3   :  { %v1793_v20 = vadd.f32 %v539_v19, %v523_v16 }
 0x7b5   :  { %1460 = vtanh.f32 %v1793_v20 }
 0x7b9   :  { %v537_v31 = vpop.permute.xlu0 %536 }
 0x7ba   :  { %v1797_v32 = vadd.f32 %v537_v31, %v522_v22 }
 0x7bc   :  { %1462 = vtanh.f32 %v1797_v32 }
 0x7bf   :  { %v1461_v33 = vpop.eup %1460 }
 0x7c0   :  { %550 = vrot.lane.b32.xlu1 %v1461_v33, %s1572_s16 }
 0x7c6   :  { %v1463_v34 = vpop.eup %1462 }
 0x7c7   :  { %548 = vrot.lane.b32.xlu0 %v1463_v34, %s1572_s16 }
 0x832   :  { %v551_v59 = vpop.permute.xlu1 %550 }
 0x833   :  { %v555_v36 = vmul.f32 %v1457_v46, %v551_v59 }
 0x835   :  { %563 = vperm.xlu1 %1359, %v555_v36  }
 0x839   :  { %1361 = vset.pattern.permute.xlu1 %v1574_v24  ;;  %v549_v37 = vpop.permute.xlu0 %548 }
 0x83a   :  { %v554_v38 = vmul.f32 %v1459_v4, %v549_v37  ;;  %581 = vperm.xlu1 %1361, %v555_v36  }
 0x83c   :  { %558 = vperm.xlu0 %1360, %v554_v38  }
 0x83e   :  { %577 = vperm.xlu1 %1361, %v554_v38  }
 0x840   :  { %1362 = vset.pattern.permute.xlu0 %v1576_v30 }
 0x841   :  { %599 = vperm.xlu0 %1362, %v555_v36  }
 0x842   :  { %1363 = vset.pattern.permute.xlu1 %v1576_v30 }
 0x843   :  { %595 = vperm.xlu1 %1363, %v554_v38  }
 0x845   :  { %1365 = vset.pattern.permute.xlu0 %v1575_v25 }
 0x846   :  { %613 = vperm.xlu0 %1365, %v554_v38  }
 0x847   :  { %1364 = vset.pattern.permute.xlu1 %v1575_v25 }
 0x848   :  { %617 = vperm.xlu1 %1364, %v555_v36  }
 0x84a   :  { %1366 = vset.pattern.permute.xlu0 %v1573_v6 }
 0x84c   :  { %1367 = vset.pattern.permute.xlu1 %v1573_v6 }
 0x8b4   :  { %v564_v62 = vpop.permute.xlu1 %563 }
 0x8b5   :  { %v567_v48 = vmul.f32 %v564_v62, %v1661_v23 }
 0x8b7   :  { %v571_v13 = vrot.slane %v567_v48, 7 }
 0x8b9   :  { %v582_v43 = vpop.permute.xlu1 %581  ;;  %v575_v60 = vadd.f32 %v571_v13, %v1688_v41 }
 0x8ba   :  { %v585_v5 = vmul.f32 %v582_v43, %v1668_v27 }
 0x8bb   :  { %v559_v44 = vpop.permute.xlu0 %558 }
 0x8bc   :  { %v566_v45 = vmul.f32 %v559_v44, %v1661_v23  ;;  %v589_v55 = vrot.slane %v585_v5, 7 }
 0x8bd   :  { %v578_v47 = vpop.permute.xlu1 %577 }
 0x8be   :  { %v570_v50 = vrot.slane %v566_v45, 7  ;;  %v584_v51 = vmul.f32 %v578_v47, %v1668_v27  ;;  %v593_v1 = vadd.f32 %v589_v55, %v575_v60  ;;  %v647_v47 = vrot.slane %v1793_v20, 7 }
 0x8c0   :  { %v600_v49 = vpop.permute.xlu0 %599  ;;  %v574_v56 = vadd.f32 %v570_v50, %v1686_v40  ;;  %v588_v57 = vrot.slane %v584_v51, 7 }
 0x8c1   :  { %v603_v52 = vmul.f32 %v600_v49, %v1680_v35  ;;  %v646_v49 = vrot.slane %v1797_v32, 7 }
 0x8c2   :  { %v596_v53 = vpop.permute.xlu1 %595  ;;  %v592_v2 = vadd.f32 %v588_v57, %v574_v56 }
 0x8c3   :  { %v602_v54 = vmul.f32 %v596_v53, %v1680_v35  ;;  %v607_v61 = vrot.slane %v603_v52, 7 }
 0x8c5   :  { %v614_v58 = vpop.permute.xlu0 %613  ;;  %v606_v63 = vrot.slane %v602_v54, 7  ;;  %v611_v3 = vadd.f32 %v607_v61, %v593_v1 }
 0x8c6   :  { %v620_v0 = vmul.f32 %v614_v58, %v1684_v39 }
 0x8c7   :  { %v618_v42 = vpop.permute.xlu1 %617  ;;  %v610_v7 = vadd.f32 %v606_v63, %v592_v2 }
 0x8c8   :  { %v621_v46 = vmul.f32 %v618_v42, %v1684_v39  ;;  %v624_v8 = vrot.slane %v620_v0, 7 }
 0x8ca   :  { %v625_v4 = vrot.slane %v621_v46, 7  ;;  %v628_v16 = vadd.f32 %v624_v8, %v610_v7 }
 0x8cc   :  { %v629_v14 = vadd.f32 %v625_v4, %v611_v3  ;;  %v1309_v31 = vmul.f32 -1.442695, %v628_v16 }
 0x8ce   :  { %1464 = vtanh.f32 %v629_v14  ;;  %v1310_v22 = vmul.f32 -1.442695, %v629_v14 }
 0x8cf   :  { %1466 = vtanh.f32 %v628_v16 }
 0x8d0   :  { %1468 = vpow2.f32 %v1310_v22 }
 0x8d1   :  { %1470 = vpow2.f32 %v1309_v31 }
 0x8d8   :  { %v1465_v19 = vpop.eup %1464 }
 0x8d9   :  { %656 = vrot.lane.b32.xlu1 %v1465_v19, %s1571_s3  ;;  %v1467_v21 = vpop.eup %1466 }
 0x8da   :  { %v1469_v33 = vpop.eup %1468 }
 0x8db   :  { %v637_v34 = vadd.f32 1.0, %v1469_v33  ;;  %v1471_v59 = vpop.eup %1470 }
 0x8dc   :  { %v636_v36 = vadd.f32 1.0, %v1471_v59 }
 0x8dd   :  { %654 = vrot.lane.b32.xlu1 %v1467_v21, %s1571_s3  ;;  %1472 = vrcp.f32 %v637_v34 }
 0x8de   :  { %1474 = vrcp.f32 %v636_v36 }
 0x8e7   :  { %v1473_v37 = vpop.eup %1472 }
 0x8e8   :  { %v1475_v43 = vpop.eup %1474  ;;  %v651_v48 = vmul.f32 %v1473_v37, %v647_v47 }
 0x8e9   :  { %v650_v51 = vmul.f32 %v1475_v43, %v646_v49 }
 0x94b   :  { %v657_v38 = vpop.permute.xlu1 %656 }
 0x94c   :  { %v661_v62 = vmul.f32 %v1473_v37, %v657_v38 }
 0x94e   :  { %666 = vrot.lane.b32.xlu0 %v661_v62, %s1572_s16 }
 0x94f   :  { %v655_v44 = vpop.permute.xlu1 %654 }
 0x950   :  { %v660_v45 = vmul.f32 %v1475_v43, %v655_v44 }
 0x952   :  { %664 = vrot.lane.b32.xlu1 %v660_v45, %s1572_s16 }
 0x9c0   :  { %v667_v5 = vpop.permute.xlu0 %666 }
 0x9c1   :  { %v1825_v50 = vadd.f32 %v667_v5, %v651_v48 }
 0x9c3   :  { %1476 = vtanh.f32 %v1825_v50 }
 0x9c4   :  { %v665_v13 = vpop.permute.xlu1 %664 }
 0x9c5   :  { %v1828_v52 = vadd.f32 %v665_v13, %v650_v51 }
 0x9c7   :  { %1478 = vtanh.f32 %v1828_v52 }
 0x9cd   :  { %v1477_v53 = vpop.eup %1476 }
 0x9ce   :  { %678 = vrot.lane.b32.xlu0 %v1477_v53, %s1572_s16 }
 0x9d1   :  { %v1479_v54 = vpop.eup %1478 }
 0x9d2   :  { %676 = vrot.lane.b32.xlu1 %v1479_v54, %s1572_s16 }
 0xa40   :  { %v679_v20 = vpop.permute.xlu0 %678 }
 0xa41   :  { %v683_v55 = vmul.f32 %v1473_v37, %v679_v20 }
 0xa43   :  { %691 = vperm.xlu0 %1366, %v683_v55  }
 0xa44   :  { %v677_v32 = vpop.permute.xlu1 %676 }
 0xa45   :  { %v682_v56 = vmul.f32 %v1475_v43, %v677_v32 }
 0xa47   :  { %686 = vperm.xlu1 %1367, %v682_v56   ;;  %1369 = vset.pattern.permute.xlu0 %v1574_v24 }
 0xa48   :  { %705 = vperm.xlu0 %1369, %v682_v56  }
 0xa4b   :  { %1368 = vset.pattern.permute.xlu1 %v1574_v24 }
 0xa4c   :  { %709 = vperm.xlu1 %1368, %v683_v55   ;;  %1371 = vset.pattern.permute.xlu0 %v1575_v25 }
 0xa4d   :  { %745 = vperm.xlu0 %1371, %v683_v55  }
 0xa50   :  { %1370 = vset.pattern.permute.xlu1 %v1576_v30 }
 0xa51   :  { %727 = vperm.xlu1 %1370, %v683_v55   ;;  %1374 = vset.pattern.permute.xlu0 %v1573_v6 }
 0xa55   :  { %723 = vperm.xlu1 %1370, %v682_v56  }
 0xa59   :  { %1372 = vset.pattern.permute.xlu1 %v1575_v25 }
 0xa5a   :  { %741 = vperm.xlu1 %1372, %v682_v56  }
 0xa5e   :  { %1373 = vset.pattern.permute.xlu1 %v1573_v6 }
 0xac2   :  { %v692_v57 = vpop.permute.xlu0 %691 }
 0xac3   :  { %v695_v61 = vmul.f32 %v692_v57, %v1661_v23 }
 0xac5   :  { %v699_v42 = vrot.slane %v695_v61, 7 }
 0xac6   :  { %v687_v58 = vpop.permute.xlu1 %686 }
 0xac7   :  { %v706_v60 = vpop.permute.xlu0 %705  ;;  %v694_v1 = vmul.f32 %v687_v58, %v1661_v23  ;;  %v703_v4 = vadd.f32 %v699_v42, %v1688_v41 }
 0xac8   :  { %v712_v16 = vmul.f32 %v706_v60, %v1668_v27 }
 0xac9   :  { %v698_v14 = vrot.slane %v694_v1, 7 }
 0xaca   :  { %v716_v36 = vrot.slane %v712_v16, 7 }
 0xacb   :  { %v710_v63 = vpop.permute.xlu1 %709  ;;  %v702_v59 = vadd.f32 %v698_v14, %v1686_v40 }
 0xacc   :  { %v713_v0 = vmul.f32 %v710_v63, %v1668_v27  ;;  %v746_v46 = vpop.permute.xlu0 %745  ;;  %v775_v63 = vrot.slane %v1825_v50, 7 }
 0xacd   :  { %v749_v7 = vmul.f32 %v746_v46, %v1684_v39  ;;  %v720_v43 = vadd.f32 %v716_v36, %v702_v59  ;;  %v774_v46 = vrot.slane %v1828_v52, 7 }
 0xace   :  { %v717_v2 = vrot.slane %v713_v0, 7 }
 0xacf   :  { %v753_v31 = vrot.slane %v749_v7, 7 }
 0xad0   :  { %v728_v3 = vpop.permute.xlu1 %727  ;;  %v721_v19 = vadd.f32 %v717_v2, %v703_v4 }
 0xad1   :  { %v731_v8 = vmul.f32 %v728_v3, %v1680_v35 }
 0xad3   :  { %v735_v21 = vrot.slane %v731_v8, 7 }
 0xad4   :  { %v724_v22 = vpop.permute.xlu1 %723 }
 0xad5   :  { %v739_v33 = vadd.f32 %v735_v21, %v721_v19  ;;  %v730_v34 = vmul.f32 %v724_v22, %v1680_v35 }
 0xad7   :  { %v757_v37 = vadd.f32 %v753_v31, %v739_v33  ;;  %v734_v38 = vrot.slane %v730_v34, 7 }
 0xad9   :  { %1480 = vtanh.f32 %v757_v37  ;;  %v742_v62 = vpop.permute.xlu1 %741  ;;  %v738_v45 = vadd.f32 %v734_v38, %v720_v43  ;;  %v1312_v51 = vmul.f32 -1.442695, %v757_v37 }
 0xada   :  { %v748_v44 = vmul.f32 %v742_v62, %v1684_v39 }
 0xadc   :  { %v752_v47 = vrot.slane %v748_v44, 7 }
 0xade   :  { %v756_v48 = vadd.f32 %v752_v47, %v738_v45 }
 0xae0   :  { %1482 = vtanh.f32 %v756_v48  ;;  %v1311_v13 = vmul.f32 -1.442695, %v756_v48 }
 0xae1   :  { %1484 = vpow2.f32 %v1312_v51 }
 0xae2   :  { %1486 = vpow2.f32 %v1311_v13 }
 0xae3   :  { %v1481_v5 = vpop.eup %1480 }
 0xae4   :  { %784 = vrot.lane.b32.xlu1 %v1481_v5, %s1571_s3 }
 0xaea   :  { %v1483_v49 = vpop.eup %1482 }
 0xaeb   :  { %782 = vrot.lane.b32.xlu0 %v1483_v49, %s1571_s3  ;;  %v1485_v53 = vpop.eup %1484 }
 0xaec   :  { %v765_v54 = vadd.f32 1.0, %v1485_v53  ;;  %v1487_v20 = vpop.eup %1486 }
 0xaed   :  { %v764_v55 = vadd.f32 1.0, %v1487_v20 }
 0xaee   :  { %1488 = vrcp.f32 %v765_v54 }
 0xaef   :  { %1490 = vrcp.f32 %v764_v55 }
 0xaf8   :  { %v1489_v32 = vpop.eup %1488 }
 0xaf9   :  { %v1491_v58 = vpop.eup %1490  ;;  %v779_v0 = vmul.f32 %v1489_v32, %v775_v63 }
 0xafa   :  { %v778_v2 = vmul.f32 %v1491_v58, %v774_v46 }
 0xb56   :  { %v785_v56 = vpop.permute.xlu1 %784 }
 0xb57   :  { %v789_v57 = vmul.f32 %v1489_v32, %v785_v56 }
 0xb59   :  { %794 = vrot.lane.b32.xlu1 %v789_v57, %s1572_s16 }
 0xb5d   :  { %v783_v60 = vpop.permute.xlu0 %782 }
 0xb5e   :  { %v788_v61 = vmul.f32 %v1491_v58, %v783_v60 }
 0xb60   :  { %792 = vrot.lane.b32.xlu0 %v788_v61, %s1572_s16 }
 0xbcb   :  { %v795_v42 = vpop.permute.xlu1 %794 }
 0xbcc   :  { %v1855_v1 = vadd.f32 %v795_v42, %v779_v0 }
 0xbce   :  { %1492 = vtanh.f32 %v1855_v1 }
 0xbd2   :  { %v793_v3 = vpop.permute.xlu0 %792 }
 0xbd3   :  { %v1859_v4 = vadd.f32 %v793_v3, %v778_v2 }
 0xbd5   :  { %1494 = vtanh.f32 %v1859_v4 }
 0xbd8   :  { %v1493_v7 = vpop.eup %1492 }
 0xbd9   :  { %806 = vrot.lane.b32.xlu1 %v1493_v7, %s1572_s16 }
 0xbdf   :  { %v1495_v8 = vpop.eup %1494 }
 0xbe0   :  { %804 = vrot.lane.b32.xlu0 %v1495_v8, %s1572_s16 }
 0xc4b   :  { %v807_v50 = vpop.permute.xlu1 %806 }
 0xc4c   :  { %v811_v14 = vmul.f32 %v1489_v32, %v807_v50 }
 0xc4e   :  { %819 = vperm.xlu1 %1373, %v811_v14  }
 0xc52   :  { %1375 = vset.pattern.permute.xlu1 %v1574_v24  ;;  %v805_v16 = vpop.permute.xlu0 %804 }
 0xc53   :  { %v810_v19 = vmul.f32 %v1491_v58, %v805_v16  ;;  %837 = vperm.xlu1 %1375, %v811_v14  }
 0xc55   :  { %814 = vperm.xlu0 %1374, %v810_v19  }
 0xc57   :  { %833 = vperm.xlu1 %1375, %v810_v19  }
 0xc59   :  { %1376 = vset.pattern.permute.xlu0 %v1576_v30 }
 0xc5a   :  { %855 = vperm.xlu0 %1376, %v811_v14  }
 0xc5b   :  { %1377 = vset.pattern.permute.xlu1 %v1576_v30 }
 0xc5c   :  { %851 = vperm.xlu1 %1377, %v810_v19  }
 0xc5e   :  { %1379 = vset.pattern.permute.xlu0 %v1575_v25 }
 0xc5f   :  { %869 = vperm.xlu0 %1379, %v810_v19  }
 0xc60   :  { %1378 = vset.pattern.permute.xlu1 %v1575_v25 }
 0xc61   :  { %873 = vperm.xlu1 %1378, %v811_v14  }
 0xc63   :  { %1380 = vset.pattern.permute.xlu0 %v1573_v6 }
 0xc65   :  { %1381 = vset.pattern.permute.xlu1 %v1573_v6 }
 0xccd   :  { %v820_v52 = vpop.permute.xlu1 %819 }
 0xcce   :  { %v823_v34 = vmul.f32 %v820_v52, %v1661_v23 }
 0xcd0   :  { %v827_v62 = vrot.slane %v823_v34, 7 }
 0xcd2   :  { %v838_v21 = vpop.permute.xlu1 %837  ;;  %v831_v51 = vadd.f32 %v827_v62, %v1688_v41 }
 0xcd3   :  { %v841_v59 = vmul.f32 %v838_v21, %v1668_v27 }
 0xcd4   :  { %v815_v22 = vpop.permute.xlu0 %814 }
 0xcd5   :  { %v822_v31 = vmul.f32 %v815_v22, %v1661_v23  ;;  %v845_v47 = vrot.slane %v841_v59, 7 }
 0xcd6   :  { %v834_v33 = vpop.permute.xlu1 %833 }
 0xcd7   :  { %v826_v37 = vrot.slane %v822_v31, 7  ;;  %v840_v38 = vmul.f32 %v834_v33, %v1668_v27  ;;  %v849_v55 = vadd.f32 %v845_v47, %v831_v51  ;;  %v903_v33 = vrot.slane %v1855_v1, 7 }
 0xcd9   :  { %v856_v36 = vpop.permute.xlu0 %855  ;;  %v830_v48 = vadd.f32 %v826_v37, %v1686_v40  ;;  %v844_v5 = vrot.slane %v840_v38, 7 }
 0xcda   :  { %v859_v43 = vmul.f32 %v856_v36, %v1680_v35  ;;  %v902_v36 = vrot.slane %v1859_v4, 7 }
 0xcdb   :  { %v852_v44 = vpop.permute.xlu1 %851  ;;  %v848_v56 = vadd.f32 %v844_v5, %v830_v48 }
 0xcdc   :  { %v858_v45 = vmul.f32 %v852_v44, %v1680_v35  ;;  %v863_v13 = vrot.slane %v859_v43, 7 }
 0xcde   :  { %v870_v49 = vpop.permute.xlu0 %869  ;;  %v862_v53 = vrot.slane %v858_v45, 7  ;;  %v867_v57 = vadd.f32 %v863_v13, %v849_v55 }
 0xcdf   :  { %v876_v54 = vmul.f32 %v870_v49, %v1684_v39 }
 0xce0   :  { %v874_v20 = vpop.permute.xlu1 %873  ;;  %v866_v60 = vadd.f32 %v862_v53, %v848_v56 }
 0xce1   :  { %v877_v32 = vmul.f32 %v874_v20, %v1684_v39  ;;  %v880_v61 = vrot.slane %v876_v54, 7 }
 0xce3   :  { %v881_v58 = vrot.slane %v877_v32, 7  ;;  %v884_v0 = vadd.f32 %v880_v61, %v866_v60 }
 0xce5   :  { %v885_v63 = vadd.f32 %v881_v58, %v867_v57  ;;  %v1313_v3 = vmul.f32 -1.442695, %v884_v0 }
 0xce7   :  { %1496 = vtanh.f32 %v885_v63  ;;  %v1314_v2 = vmul.f32 -1.442695, %v885_v63 }
 0xce8   :  { %1498 = vtanh.f32 %v884_v0 }
 0xce9   :  { %1500 = vpow2.f32 %v1314_v2 }
 0xcea   :  { %1502 = vpow2.f32 %v1313_v3 }
 0xcf1   :  { %v1497_v42 = vpop.eup %1496 }
 0xcf2   :  { %912 = vrot.lane.b32.xlu1 %v1497_v42, %s1571_s3  ;;  %v1499_v46 = vpop.eup %1498 }
 0xcf3   :  { %v1501_v7 = vpop.eup %1500 }
 0xcf4   :  { %v893_v8 = vadd.f32 1.0, %v1501_v7  ;;  %v1503_v50 = vpop.eup %1502 }
 0xcf5   :  { %v892_v14 = vadd.f32 1.0, %v1503_v50 }
 0xcf6   :  { %910 = vrot.lane.b32.xlu1 %v1499_v46, %s1571_s3  ;;  %1504 = vrcp.f32 %v893_v8 }
 0xcf7   :  { %1506 = vrcp.f32 %v892_v14 }
 0xd00   :  { %v1505_v16 = vpop.eup %1504 }
 0xd01   :  { %v1507_v21 = vpop.eup %1506  ;;  %v907_v34 = vmul.f32 %v1505_v16, %v903_v33 }
 0xd02   :  { %v906_v38 = vmul.f32 %v1507_v21, %v902_v36 }
 0xd64   :  { %v913_v19 = vpop.permute.xlu1 %912 }
 0xd65   :  { %v917_v52 = vmul.f32 %v1505_v16, %v913_v19 }
 0xd67   :  { %922 = vrot.lane.b32.xlu0 %v917_v52, %s1572_s16 }
 0xd68   :  { %v911_v22 = vpop.permute.xlu1 %910 }
 0xd69   :  { %v916_v31 = vmul.f32 %v1507_v21, %v911_v22 }
 0xd6b   :  { %920 = vrot.lane.b32.xlu1 %v916_v31, %s1572_s16 }
 0xdd9   :  { %v923_v59 = vpop.permute.xlu0 %922 }
 0xdda   :  { %v1887_v37 = vadd.f32 %v923_v59, %v907_v34  ;;  %v1068_v34 = vld [vmem:[%s1981_s4] sm:$0x7] }
 0xddb   :  { %v1078_v59 = vrot.slane %v1068_v34, %v1635_v9  ;;  %v1072_v36 = vrot.slane %v1068_v34, %v1641_v12 }
 0xddc   :  { %1508 = vtanh.f32 %v1887_v37 }
 0xddd   :  { %v921_v62 = vpop.permute.xlu1 %920 }
 0xdde   :  { %v1890_v43 = vadd.f32 %v921_v62, %v906_v38  ;;  %v1080_v38 = vmul.f32 %v1078_v59, %v1650_v17 }
 0xde0   :  { %1510 = vtanh.f32 %v1890_v43 }
 0xde6   :  { %v1509_v44 = vpop.eup %1508 }
 0xde7   :  { %934 = vrot.lane.b32.xlu0 %v1509_v44, %s1572_s16  ;;  %v1074_v44 = vmul.f32 %v1072_v36, %v1639_v11 }
 0xdea   :  { %v1511_v45 = vpop.eup %1510 }
 0xdeb   :  { %932 = vrot.lane.b32.xlu1 %v1511_v45, %s1572_s16 }
 0xe59   :  { %v935_v1 = vpop.permute.xlu0 %934 }
 0xe5a   :  { %v939_v47 = vmul.f32 %v1505_v16, %v935_v1  ;;  %v1082_v1 = vadd.f32 %v1080_v38, %v1074_v44 }
 0xe5c   :  { %947 = vperm.xlu0 %1380, %v939_v47  }
 0xe5d   :  { %v933_v4 = vpop.permute.xlu1 %932 }
 0xe5e   :  { %v938_v48 = vmul.f32 %v1507_v21, %v933_v4 }
 0xe60   :  { %942 = vperm.xlu1 %1381, %v938_v48   ;;  %1383 = vset.pattern.permute.xlu0 %v1574_v24 }
 0xe61   :  { %961 = vperm.xlu0 %1383, %v938_v48  }
 0xe64   :  { %1382 = vset.pattern.permute.xlu1 %v1574_v24 }
 0xe65   :  { %965 = vperm.xlu1 %1382, %v939_v47   ;;  %1385 = vset.pattern.permute.xlu0 %v1575_v25 }
 0xe66   :  { %1001 = vperm.xlu0 %1385, %v939_v47  }
 0xe69   :  { %1384 = vset.pattern.permute.xlu1 %v1576_v30 }
 0xe6a   :  { %983 = vperm.xlu1 %1384, %v939_v47   ;;  %1388 = vset.pattern.permute.xlu0 %v1574_v24 }
 0xe6e   :  { %979 = vperm.xlu1 %1384, %v938_v48  }
 0xe72   :  { %1386 = vset.pattern.permute.xlu1 %v1575_v25 }
 0xe73   :  { %997 = vperm.xlu1 %1386, %v938_v48   ;;  %v1079_v48 = vmul.f32 %v1078_v59, %v1652_v18 }
 0xe77   :  { %1387 = vset.pattern.permute.xlu1 %v1573_v6 }
 0xedb   :  { %v948_v5 = vpop.permute.xlu0 %947 }
 0xedc   :  { %v951_v13 = vmul.f32 %v948_v5, %v1661_v23  ;;  %v1317_v5 = vld [vmem:[%s1982_s5] ss:$0 sm:$0xff]  ;;  %s1577_s5 = smov 8  }
 0xede   :  { %v955_v20 = vrot.slane %v951_v13, 7 }
 0xedf   :  { %v943_v49 = vpop.permute.xlu1 %942 }
 0xee0   :  { %v962_v51 = vpop.permute.xlu0 %961  ;;  %v950_v55 = vmul.f32 %v943_v49, %v1661_v23  ;;  %v959_v58 = vadd.f32 %v955_v20, %v1688_v41 }
 0xee1   :  { %v968_v0 = vmul.f32 %v962_v51, %v1668_v27  ;;  %v1073_v51 = vmul.f32 %v1072_v36, %v1637_v10 }
 0xee2   :  { %v954_v63 = vrot.slane %v950_v55, 7 }
 0xee3   :  { %v972_v50 = vrot.slane %v968_v0, 7 }
 0xee4   :  { %v966_v53 = vpop.permute.xlu1 %965  ;;  %v958_v23 = vadd.f32 %v954_v63, %v1686_v40 }
 0xee5   :  { %v969_v54 = vmul.f32 %v966_v53, %v1668_v27  ;;  %v1002_v32 = vpop.permute.xlu0 %1001  ;;  %v1081_v53 = vadd.f32 %v1079_v48, %v1073_v51 }
 0xee6   :  { %v1005_v60 = vmul.f32 %v1002_v32, %v1684_v39  ;;  %v976_v19 = vadd.f32 %v972_v50, %v958_v23  ;;  %v1030_v23 = vrot.slane %v1890_v43, 7 }
 0xee7   :  { %v973_v56 = vrot.slane %v969_v54, 7 }
 0xee8   :  { %v1009_v3 = vrot.slane %v1005_v60, 7 }
 0xee9   :  { %v984_v57 = vpop.permute.xlu1 %983  ;;  %v977_v42 = vadd.f32 %v973_v56, %v959_v58 }
 0xeea   :  { %v987_v61 = vmul.f32 %v984_v57, %v1680_v35 }
 0xeec   :  { %v991_v46 = vrot.slane %v987_v61, 7 }
 0xeed   :  { %v980_v2 = vpop.permute.xlu1 %979 }
 0xeee   :  { %v995_v7 = vadd.f32 %v991_v46, %v977_v42  ;;  %v986_v8 = vmul.f32 %v980_v2, %v1680_v35  ;;  %v1031_v46 = vrot.slane %v1887_v37, 7 }
 0xef0   :  { %v1013_v14 = vadd.f32 %v1009_v3, %v995_v7  ;;  %v990_v16 = vrot.slane %v986_v8, 7 }
 0xef2   :  { %1512 = vtanh.f32 %v1013_v14  ;;  %v998_v41 = vpop.permute.xlu1 %997  ;;  %v994_v21 = vadd.f32 %v990_v16, %v976_v19  ;;  %v1316_v35 = vmul.f32 -1.442695, %v1013_v14 }
 0xef3   :  { %v1004_v52 = vmul.f32 %v998_v41, %v1684_v39  ;;  %v1086_v39 = vrot.slane %v1068_v34, %v1647_v15 }
 0xef5   :  { %v1008_v22 = vrot.slane %v1004_v52, 7  ;;  %v1088_v45 = vmul.f32 %v1086_v39, %v1672_v29  ;;  %v1087_v17 = vmul.f32 %v1086_v39, %v1670_v28 }
 0xef7   :  { %v1012_v27 = vadd.f32 %v1008_v22, %v994_v21  ;;  %v1090_v4 = vadd.f32 %v1088_v45, %v1082_v1  ;;  %v1089_v54 = vadd.f32 %v1087_v17, %v1081_v53 }
 0xef9   :  { %1514 = vtanh.f32 %v1012_v27  ;;  %v1315_v40 = vmul.f32 -1.442695, %v1012_v27  ;;  %v1099_v13 = vadd.f32 %v1317_v5, %v1090_v4  ;;  %v1098_v29 = vadd.f32 %v1317_v5, %v1089_v54  ;;  %v1136_v4 = vld [vmem:[%s1983_s6] sm:$0xf] }
 0xefa   :  { %1516 = vpow2.f32 %v1316_v35  ;;  %v1151_v48 = vrot.slane %v1136_v4, %v1641_v12  ;;  %v1181_v17 = vrot.slane %v1136_v4, %v1647_v15  ;;  %v1137_v54 = vld [vmem:[%s1984_s7] sm:$0xf] }
 0xefb   :  { %1518 = vpow2.f32 %v1315_v40  ;;  %v1319_v58 = vmul.f32 -1.442695, %v1099_v13  ;;  %v1318_v60 = vmul.f32 -1.442695, %v1098_v29 }
 0xefc   :  { %v1513_v31 = vpop.eup %1512 }
 0xefd   :  { %1040 = vrot.lane.b32.xlu1 %v1513_v31, %s1571_s3 }
 0xf03   :  { %v1515_v33 = vpop.eup %1514 }
 0xf04   :  { %1038 = vrot.lane.b32.xlu0 %v1515_v33, %s1571_s3  ;;  %v1517_v62 = vpop.eup %1516 }
 0xf05   :  { %v1021_v47 = vadd.f32 1.0, %v1517_v62  ;;  %v1519_v49 = vpop.eup %1518 }
 0xf06   :  { %v1020_v11 = vadd.f32 1.0, %v1519_v49 }
 0xf07   :  { %1520 = vrcp.f32 %v1021_v47 }
 0xf08   :  { %1522 = vtanh.f32 %v1099_v13 }
 0xf09   :  { %1524 = vrcp.f32 %v1020_v11 }
 0xf0a   :  { %1526 = vtanh.f32 %v1098_v29 }
 0xf0b   :  { %1528 = vpow2.f32 %v1319_v58  ;;  %v1231_v58 = vrot.slane %v1137_v54, %v1635_v9 }
 0xf0c   :  { %1530 = vpow2.f32 %v1318_v60 }
 0xf11   :  { %v1521_v20 = vpop.eup %1520 }
 0xf12   :  { %v1523_v32 = vpop.eup %1522  ;;  %v1035_v2 = vmul.f32 %v1521_v20, %v1031_v46 }
 0xf13   :  { %v1525_v56 = vpop.eup %1524 }
 0xf14   :  { %v1527_v28 = vpop.eup %1526  ;;  %v1034_v16 = vmul.f32 %v1525_v56, %v1030_v23 }
 0xf15   :  { %v1529_v61 = vpop.eup %1528 }
 0xf16   :  { %v1107_v63 = vadd.f32 1.0, %v1529_v61  ;;  %v1531_v0 = vpop.eup %1530 }
 0xf17   :  { %v1106_v42 = vadd.f32 1.0, %v1531_v0 }
 0xf18   :  { %1532 = vrcp.f32 %v1107_v63 }
 0xf19   :  { %1534 = vrcp.f32 %v1106_v42 }
 0xf22   :  { %v1533_v8 = vpop.eup %1532 }
 0xf23   :  { %v1535_v52 = vpop.eup %1534 }
 0xf6f   :  { %v1041_v55 = vpop.permute.xlu1 %1040 }
 0xf70   :  { %v1045_v18 = vmul.f32 %v1521_v20, %v1041_v55 }
 0xf72   :  { %1050 = vrot.lane.b32.xlu1 %v1045_v18, %s1572_s16 }
 0xf76   :  { %1118 = vrot.lane.b32.xlu1 %v1523_v32, %s1571_s3  ;;  %v1039_v10 = vpop.permute.xlu0 %1038 }
 0xf77   :  { %v1044_v57 = vmul.f32 %v1525_v56, %v1039_v10 }
 0xf79   :  { %1048 = vrot.lane.b32.xlu0 %v1044_v57, %s1572_s16 }
 0xf7d   :  { %1116 = vrot.lane.b32.xlu0 %v1527_v28, %s1571_s3 }
 0xfe4   :  { %v1051_v3 = vpop.permute.xlu1 %1050 }
 0xfe5   :  { %v1055_v7 = vadd.f32 %v1051_v3, %v1035_v2 }
 0xfe7   :  { %1536 = vtanh.f32 %v1055_v7  ;;  %v1247_v7 = vrot.slane %v1137_v54, %v1647_v15 }
 0xfe8   :  { %v1119_v50 = vpop.permute.xlu1 %1118 }
 0xfe9   :  { %v1123_v14 = vmul.f32 %v1533_v8, %v1119_v50 }
 0xfeb   :  { %1538 = vtanh.f32 %v1123_v14  ;;  %v1049_v41 = vpop.permute.xlu0 %1048 }
 0xfec   :  { %v1054_v19 = vadd.f32 %v1049_v41, %v1034_v16  ;;  %v1263_v16 = vrot.slane %v1137_v54, %v1665_v26 }
 0xfee   :  { %1540 = vtanh.f32 %v1054_v19 }
 0xfef   :  { %v1117_v21 = vpop.permute.xlu0 %1116 }
 0xff0   :  { %v1122_v22 = vmul.f32 %v1535_v52, %v1117_v21 }
 0xff1   :  { %v1537_v27 = vpop.eup %1536 }
 0xff2   :  { %1542 = vtanh.f32 %v1122_v22  ;;  %1062 = vrot.lane.b32.xlu1 %v1537_v27, %s1572_s16  ;;  %v1320_v27 = vld [vmem:[%s1985_s8] ss:$0 sm:$0xff] }
 0xff5   :  { %v1539_v37 = vpop.eup %1538 }
 0xff6   :  { %1130 = vrot.lane.b32.xlu1 %v1539_v37, %s1577_s5 }
 0xff8   :  { %v1541_v31 = vpop.eup %1540 }
 0xff9   :  { %1060 = vrot.lane.b32.xlu0 %v1541_v31, %s1572_s16 }
 0xffc   :  { %v1543_v43 = vpop.eup %1542 }
 0xffd   :  { %1128 = vrot.lane.b32.xlu0 %v1543_v43, %s1577_s5 }
0x1064   :  { %v1063_v33 = vpop.permute.xlu1 %1062 }
0x1065   :  { %v1067_v59 = vmul.f32 %v1521_v20, %v1063_v33  ;;  %v1197_v20 = vrot.slane %v1136_v4, %v1665_v26 }
0x1068   :  { %v1131_v35 = vpop.permute.xlu1 %1130 }
0x1069   :  { %v1135_v40 = vmul.f32 %v1533_v8, %v1131_v35 }
0x106b   :  { %1209 = vperm.xlu1 %1387, %v1135_v40   ;;  %1225 = vperm.xlu0 %1388, %v1135_v40   ;;  %v1061_v34 = vpop.permute.xlu0 %1060 }
0x106c   :  { %v1066_v38 = vmul.f32 %v1525_v56, %v1061_v34  ;;  %v1215_v56 = vrot.slane %v1137_v54, %v1641_v12 }
0x106f   :  { %1159 = vperm.xlu0 %1388, %v1067_v59   ;;  %v1129_v39 = vpop.permute.xlu0 %1128 }
0x1070   :  { %v1134_v36 = vmul.f32 %v1535_v52, %v1129_v39 }
0x1072   :  { %1204 = vperm.xlu1 %1387, %v1134_v36  }
0x1073   :  { %1392 = vset.pattern.permute.xlu0 %v1576_v30 }
0x1074   :  { %1175 = vperm.xlu0 %1392, %v1067_v59  }
0x1076   :  { %1389 = vset.pattern.permute.xlu1 %v1574_v24 }
0x1077   :  { %1221 = vperm.xlu1 %1389, %v1134_v36  }
0x1078   :  { %1396 = vset.pattern.permute.xlu0 %v1575_v25 }
0x1079   :  { %1187 = vperm.xlu0 %1396, %v1066_v38  }
0x107b   :  { %1390 = vset.pattern.permute.xlu1 %v1573_v6 }
0x107c   :  { %1145 = vperm.xlu1 %1390, %v1067_v59  }
0x107d   :  { %1397 = vset.pattern.permute.xlu0 %v1576_v30 }
0x107e   :  { %1237 = vperm.xlu0 %1397, %v1134_v36  }
0x1080   :  { %1140 = vperm.xlu1 %1390, %v1066_v38  }
0x1082   :  { %1399 = vset.pattern.permute.xlu0 %v1575_v25 }
0x1084   :  { %1391 = vset.pattern.permute.xlu1 %v1574_v24 }
0x1085   :  { %1155 = vperm.xlu1 %1391, %v1066_v38  }
0x1089   :  { %1393 = vset.pattern.permute.xlu1 %v1576_v30 }
0x108a   :  { %1171 = vperm.xlu1 %1393, %v1066_v38  }
0x108e   :  { %1394 = vset.pattern.permute.xlu1 %v1575_v25 }
0x108f   :  { %1191 = vperm.xlu1 %1394, %v1067_v59  }
0x1093   :  { %1395 = vset.pattern.permute.xlu1 %v1576_v30  ;;  %v1165_v30 = vrot.slane %v1136_v4, %v1635_v9 }
0x1094   :  { %1241 = vperm.xlu1 %1395, %v1135_v40  }
0x1098   :  { %1398 = vset.pattern.permute.xlu1 %v1575_v25 }
0x1099   :  { %1257 = vperm.xlu1 %1398, %v1135_v40  }
0x109d   :  { %1253 = vperm.xlu1 %1398, %v1134_v36  }
0x10ea   :  { %v1210_v6 = vpop.permute.xlu1 %1209  ;;  %v1226_v45 = vpop.permute.xlu0 %1225 }
0x10eb   :  { %v1217_v0 = vmul.f32 %v1215_v56, %v1210_v6  ;;  %v1233_v2 = vmul.f32 %v1231_v58, %v1226_v45 }
0x10ee   :  { %v1160_v47 = vpop.permute.xlu0 %1159 }
0x10ef   :  { %v1167_v13 = vmul.f32 %v1165_v30, %v1160_v47 }
0x10f1   :  { %v1205_v62 = vpop.permute.xlu1 %1204 }
0x10f2   :  { %v1216_v3 = vmul.f32 %v1215_v56, %v1205_v62 }
0x10f3   :  { %v1176_v49 = vpop.permute.xlu0 %1175 }
0x10f4   :  { %v1183_v10 = vmul.f32 %v1181_v17, %v1176_v49 }
0x10f6   :  { %v1222_v44 = vpop.permute.xlu1 %1221 }
0x10f7   :  { %v1232_v41 = vmul.f32 %v1231_v58, %v1222_v44 }
0x10f8   :  { %v1188_v32 = vpop.permute.xlu0 %1187 }
0x10f9   :  { %v1198_v60 = vmul.f32 %v1197_v20, %v1188_v32 }
0x10fb   :  { %v1146_v1 = vpop.permute.xlu1 %1145 }
0x10fc   :  { %v1153_v25 = vmul.f32 %v1151_v48, %v1146_v1 }
0x10fd   :  { %v1238_v19 = vpop.permute.xlu0 %1237 }
0x10fe   :  { %v1169_v55 = vadd.f32 %v1167_v13, %v1153_v25  ;;  %v1248_v37 = vmul.f32 %v1247_v7, %v1238_v19 }
0x10ff   :  { %v1141_v24 = vpop.permute.xlu1 %1140 }
0x1100   :  { %v1152_v53 = vmul.f32 %v1151_v48, %v1141_v24  ;;  %v1185_v61 = vadd.f32 %v1183_v10, %v1169_v55 }
0x1104   :  { %v1156_v5 = vpop.permute.xlu1 %1155 }
0x1105   :  { %v1166_v51 = vmul.f32 %v1165_v30, %v1156_v5 }
0x1107   :  { %v1168_v18 = vadd.f32 %v1166_v51, %v1152_v53 }
0x1109   :  { %v1172_v11 = vpop.permute.xlu1 %1171 }
0x110a   :  { %v1182_v29 = vmul.f32 %v1181_v17, %v1172_v11 }
0x110c   :  { %v1184_v57 = vadd.f32 %v1182_v29, %v1168_v18 }
0x110e   :  { %v1192_v28 = vpop.permute.xlu1 %1191  ;;  %v1200_v42 = vadd.f32 %v1198_v60, %v1184_v57 }
0x110f   :  { %v1199_v63 = vmul.f32 %v1197_v20, %v1192_v28 }
0x1110   :  { %v1218_v50 = vadd.f32 %v1216_v3, %v1200_v42 }
0x1111   :  { %v1201_v46 = vadd.f32 %v1199_v63, %v1185_v61 }
0x1112   :  { %v1234_v22 = vadd.f32 %v1232_v41, %v1218_v50 }
0x1113   :  { %v1219_v8 = vadd.f32 %v1217_v0, %v1201_v46  ;;  %v1242_v23 = vpop.permute.xlu1 %1241 }
0x1114   :  { %v1249_v12 = vmul.f32 %v1247_v7, %v1242_v23  ;;  %v1250_v33 = vadd.f32 %v1248_v37, %v1234_v22 }
0x1115   :  { %v1235_v14 = vadd.f32 %v1233_v2, %v1219_v8 }
0x1117   :  { %v1251_v52 = vadd.f32 %v1249_v12, %v1235_v14 }
0x1118   :  { %v1258_v9 = vpop.permute.xlu1 %1257 }
0x1119   :  { %v1265_v21 = vmul.f32 %v1263_v16, %v1258_v9 }
0x111b   :  { %v1267_v31 = vadd.f32 %v1265_v21, %v1251_v52 }
0x111c   :  { %v1254_v15 = vpop.permute.xlu1 %1253 }
0x111d   :  { %v1276_v43 = vadd.f32 %v1320_v27, %v1267_v31  ;;  %v1264_v35 = vmul.f32 %v1263_v16, %v1254_v15 }
0x111f   :  { %v1279_v26 = vrot.slane %v1276_v43, 7  ;;  %v1266_v40 = vadd.f32 %v1264_v35, %v1250_v33 }
0x1121   :  { %v1275_v34 = vadd.f32 %v1320_v27, %v1266_v40  ;;  %1285 = vst.msk [vmem:[#allocation2 + $0x1] sm:$0x1] %vm1284_vm0, %v1279_v26 }
0x1123   :  { %1283 = vst.msk [vmem:[#allocation2 - $0x7] sm:$0x80] %vm1282_vm1, %v1275_v34 }
0x1124   :  { %1555 = shalt.err (!%p1552_p4)
}
0x1125   :  { %s1556_s28 = scalar_lea.hbm %s1986_s9, 32 }
0x1126   :  { %p1557_p5 = scmp.ne.s32.totalorder %s1986_s9, %s1556_s28  ;;  %p1560_p6 = scmp.lt.u32.totalorder %s1556_s28, %s1986_s9 }
0x1128   :  { %p1562_p7 = pnand %p1560_p6, %p1557_p5 }
0x112a   :  { %1565 = shalt.err (!%p1562_p7)
}
0x112b   :  { %1295 = dma.vmem_to_hbm [thread:$0]  %s1293_s25, 32, %s1986_s9, [#allocation3]  }
0x112c   :  { %1566 = dma.done.wait [#allocation3], 32  }
0x112d   :  { %1567 = vsyncadd [#allocation3], 4294967264 }
0x112e   :  { %1299 = vsyncpa [#allocation3], 1 }

</bundles_post_ra>
